<compile_context>
chip_gen: v7x
topology: tpu7x:2x2x1
jax: 0.10.0
libtpu: 0.0.40
codegen_flags: <defaults>
</compile_context>

<pallas_src>
import functools

import jax
import jax.numpy as jnp
from jax import lax
from jax.experimental import pallas as pl
from jax.experimental.pallas import tpu as pltpu


# ---------------------------------------------------------------------------
# Pallas kernel: the whole hot path (LSTM recurrence + head) runs in VMEM.
# ---------------------------------------------------------------------------
def _stock_lstm_kernel(x_ref,                          # (T*B, I)  bf16, time-major flat
                       wih1_ref, b1_ref, whh1_ref,     # (I,4H) bf16, (1,4H) f32, (H,4H) bf16
                       wih2_ref, whh2_ref, b2_ref,     # (H,4H) bf16, (H,4H) bf16, (1,4H) f32
                       ln_w_ref, ln_b_ref,             # LayerNorm gamma/beta (1, H) f32
                       fc1_w_ref, fc1_b_ref,           # (H, H//2) bf16, (1, H//2) f32
                       fc2_w_ref, fc2_b_ref,           # (H//2, O) bf16, (1, O) f32
                       out_ref,                        # (B, O) f32
                       *, hidden_size, seq_len, batch):
    H = hidden_size
    T = seq_len
    B = batch
    G = 4 * H

    # ---- Hoisted layer-1 input projection: one bf16 MXU matmul (b1 folded).
    #      Depends only on x, so it sits entirely off the recurrence chain.
    xproj = (
        jnp.dot(x_ref[...], wih1_ref[...], preferred_element_type=jnp.float32)
        + b1_ref[...]
    )                                                   # (T*B, 4H) f32

    # ---- Recurrent weights loaded once; bias broadcast hoisted out of the loop.
    whh1 = whh1_ref[...]                                # (H, 4H) bf16
    wih2 = wih2_ref[...]                                # (H, 4H) bf16
    whh2 = whh2_ref[...]                                # (H, 4H) bf16
    b2b = jnp.broadcast_to(b2_ref[...], (B, G))         # (B, 4H) f32, hoisted

    def activate(gates):
        # Gate columns were permuted to (i, f, o, g): one contiguous sigmoid
        # slab (B, 3H) + one tanh slab (B, H) instead of 4 narrow slices.
        sig = jax.nn.sigmoid(gates[:, : 3 * H])
        g = jnp.tanh(gates[:, 3 * H:])
        return sig[:, :H], sig[:, H:2 * H], sig[:, 2 * H:3 * H], g

    h1 = jnp.zeros((B, H), jnp.float32)
    c1 = jnp.zeros((B, H), jnp.float32)
    h2 = jnp.zeros((B, H), jnp.float32)
    c2 = jnp.zeros((B, H), jnp.float32)

    # TODO(synk): could stage whh1/wih2/whh2 once in the MXU weight registers
    #             (pltpu.matmul_push_rhs / matmul_acc_lhs / matmul_pop) to drop
    #             the per-step RHS push; kept on jnp.dot for robustness.
    # Fully-unrolled static loop (T small, static): one basic block -> the LLO
    # scheduler can overlap layer-2(t) with layer-1(t+1) and hide EUP latency.
    for t in range(T):
        # ---- Layer-2 recurrent half: depends only on h2[t-1], so it overlaps
        #      layer-1 of this step (this is the un-fused layer-2 matmul).
        r2 = jnp.dot(h2.astype(jnp.bfloat16), whh2,
                     preferred_element_type=jnp.float32)

        # ---- Layer 1: only the recurrent matmul is on the critical path.
        #      Static slice of a value -> no masked/dynamic sublane load.
        g1 = xproj[t * B:(t + 1) * B, :] + jnp.dot(
            h1.astype(jnp.bfloat16), whh1, preferred_element_type=jnp.float32)
        i1, f1, o1, gg1 = activate(g1)
        c1 = f1 * c1 + i1 * gg1
        h1 = o1 * jnp.tanh(c1)

        # ---- Layer 2: only the small h1@wih2 dot sits after h1[t].
        # TODO(synk): PyTorch applies inter-layer dropout only in training
        #             mode; eval semantics (identity) are implemented here.
        g2 = jnp.dot(h1.astype(jnp.bfloat16), wih2,
                     preferred_element_type=jnp.float32) + r2 + b2b
        i2, f2, o2, gg2 = activate(g2)
        c2 = f2 * c2 + i2 * gg2
        h2 = o2 * jnp.tanh(c2)

    # TODO(synk): audit vrot/vsel counts for the i/f/o lane-quarter extraction;
    #             if chained, do the cell combine in gate-lane space instead.

    # LayerNorm over the hidden dim (biased variance, eps = 1e-5), f32 like torch.
    mu = jnp.mean(h2, axis=-1, keepdims=True)
    var = jnp.mean((h2 - mu) ** 2, axis=-1, keepdims=True)
    ln = (h2 - mu) * lax.rsqrt(var + 1e-5) * ln_w_ref[...] + ln_b_ref[...]

    # Dropout is identity in eval mode.  Head matmuls: bf16 operands, f32 acc.
    z = jnp.dot(ln.astype(jnp.bfloat16), fc1_w_ref[...],
                preferred_element_type=jnp.float32) + fc1_b_ref[...]
    z = jnp.maximum(z, 0.0)
    out = jnp.dot(z.astype(jnp.bfloat16), fc2_w_ref[...],
                  preferred_element_type=jnp.float32) + fc2_b_ref[...]
    out_ref[...] = out.astype(out_ref.dtype)


# ---------------------------------------------------------------------------
# Wrapper: parameter plumbing (gate reorder, bf16 casts) + pallas_call.
# ---------------------------------------------------------------------------
def _reorder_ifgo_to_ifog(w, H):
    """Permute gate blocks along the last axis: (i, f, g, o) -> (i, f, o, g)."""
    return jnp.concatenate(
        [w[..., : 2 * H], w[..., 3 * H:], w[..., 2 * H:3 * H]], axis=-1)


def stock_lstm_forward(x, params, *, hidden_size):
    """x: (B, T, I) float32.  Returns (B, output_size) float32."""
    B, T, I = x.shape
    H = hidden_size
    O = params["fc2_w"].shape[1]

    # Time-major + flattened to (T*B, I) so the hoisted input projection is a
    # single plain 2-D matmul inside the kernel.  MXU operands go in as bf16.
    # TODO(synk): at production shapes fold this transpose into a T-grid
    #             BlockSpec index_map (free layout plumbing, no HBM round-trip).
    x_tm = jnp.transpose(x, (1, 0, 2)).reshape(T * B, I).astype(jnp.bfloat16)

    # One-time weight prep: gate-column permutation + bf16 cast for MXU operands.
    # Biases / LayerNorm params stay f32 (added on the f32 accumulate path).
    wih1 = _reorder_ifgo_to_ifog(params["wih1"], H).astype(jnp.bfloat16)
    whh1 = _reorder_ifgo_to_ifog(params["whh1"], H).astype(jnp.bfloat16)
    b1 = _reorder_ifgo_to_ifog(params["b1"], H)
    wih2 = _reorder_ifgo_to_ifog(params["wih2"], H).astype(jnp.bfloat16)
    whh2 = _reorder_ifgo_to_ifog(params["whh2"], H).astype(jnp.bfloat16)
    b2 = _reorder_ifgo_to_ifog(params["b2"], H)

    args = (
        x_tm,
        wih1, b1, whh1,
        wih2, whh2, b2,
        params["ln_w"], params["ln_b"],
        params["fc1_w"].astype(jnp.bfloat16), params["fc1_b"],
        params["fc2_w"].astype(jnp.bfloat16), params["fc2_b"],
    )
    vmem_spec = pl.BlockSpec(memory_space=pltpu.MemorySpace.VMEM)
    kernel = functools.partial(_stock_lstm_kernel,
                               hidden_size=H, seq_len=T, batch=B)

    # TODO(synk): for production B, add a batch grid axis with
    #             dimension_semantics=("parallel",) (megacore split on v7x) and
    #             stream x over a T grid / emit_pipeline so per-core VMEM stays
    #             bounded on v7x (64 MiB).  At these shapes everything is KB-scale.
    return pl.pallas_call(
        kernel,
        out_shape=jax.ShapeDtypeStruct((B, O), jnp.float32),
        in_specs=[vmem_spec] * len(args),
        out_specs=vmem_spec,
    )(*args)


# ---------------------------------------------------------------------------
# Deterministic parameter init (same shapes / init ranges as nn.LSTM / Linear).
# Stored in PyTorch gate order (i, f, g, o); the wrapper permutes for the kernel.
# ---------------------------------------------------------------------------
def init_params(key, input_size, hidden_size, output_size):
    H = hidden_size
    ks = list(jax.random.split(key, 16))
    k_lstm = 1.0 / jnp.sqrt(H)

    def u(key, shape, k):
        return jax.random.uniform(key, shape, jnp.float32, -k, k)

    # LSTM layer 1 (weights stored pre-transposed: (in, 4H)); biases folded.
    wih1 = u(ks[0], (input_size, 4 * H), k_lstm)
    whh1 = u(ks[1], (H, 4 * H), k_lstm)
    b1 = u(ks[2], (1, 4 * H), k_lstm) + u(ks[3], (1, 4 * H), k_lstm)
    # LSTM layer 2 (input is H).
    wih2 = u(ks[4], (H, 4 * H), k_lstm)
    whh2 = u(ks[5], (H, 4 * H), k_lstm)
    b2 = u(ks[6], (1, 4 * H), k_lstm) + u(ks[7], (1, 4 * H), k_lstm)
    # LayerNorm.
    ln_w = jnp.ones((1, H), jnp.float32)
    ln_b = jnp.zeros((1, H), jnp.float32)
    # fc1: Linear(H -> H//2), fc2: Linear(H//2 -> output_size).
    k_fc1 = 1.0 / jnp.sqrt(H)
    k_fc2 = 1.0 / jnp.sqrt(H // 2)
    fc1_w = u(ks[8], (H, H // 2), k_fc1)
    fc1_b = u(ks[9], (1, H // 2), k_fc1)
    fc2_w = u(ks[10], (H // 2, output_size), k_fc2)
    fc2_b = u(ks[11], (1, output_size), k_fc2)

    return dict(wih1=wih1, whh1=whh1, b1=b1,
                wih2=wih2, whh2=whh2, b2=b2,
                ln_w=ln_w, ln_b=ln_b,
                fc1_w=fc1_w, fc1_b=fc1_b,
                fc2_w=fc2_w, fc2_b=fc2_b)


# ---------------------------------------------------------------------------
# Pure-JAX f32 reference (PyTorch gate order, unfused) for a correctness check.
# ---------------------------------------------------------------------------
def stock_lstm_ref(x, params, *, hidden_size):
    H = hidden_size
    B = x.shape[0]

    def cell(x_t, h, c, wih, whh, b):
        g = x_t @ wih + h @ whh + b
        i = jax.nn.sigmoid(g[:, :H])
        f = jax.nn.sigmoid(g[:, H:2 * H])
        gg = jnp.tanh(g[:, 2 * H:3 * H])
        o = jax.nn.sigmoid(g[:, 3 * H:])
        c = f * c + i * gg
        return o * jnp.tanh(c), c

    def step(carry, x_t):
        h1, c1, h2, c2 = carry
        h1, c1 = cell(x_t, h1, c1, params["wih1"], params["whh1"], params["b1"])
        h2, c2 = cell(h1, h2, c2, params["wih2"], params["whh2"], params["b2"])
        return (h1, c1, h2, c2), None

    z = jnp.zeros((B, H), jnp.float32)
    (h1, c1, h2, c2), _ = lax.scan(step, (z, z, z, z), jnp.transpose(x, (1, 0, 2)))
    mu = jnp.mean(h2, axis=-1, keepdims=True)
    var = jnp.mean((h2 - mu) ** 2, axis=-1, keepdims=True)
    ln = (h2 - mu) * lax.rsqrt(var + 1e-5) * params["ln_w"] + params["ln_b"]
    y = jnp.maximum(ln @ params["fc1_w"] + params["fc1_b"], 0.0)
    return y @ params["fc2_w"] + params["fc2_b"]


if __name__ == "__main__":
    # Small shapes consistent with the module's forward:
    # x: (batch=2, seq=8, input_size=15), hidden_size=32, output_size=1.
    B, T, I, H, O = 2, 8, 15, 32, 1
    key = jax.random.PRNGKey(0)
    k_x, k_p = jax.random.split(key)
    x = jax.random.normal(k_x, (B, T, I), jnp.float32)
    params = init_params(k_p, I, H, O)

    out = stock_lstm_forward(x, params, hidden_size=H)
    out = jax.block_until_ready(out)
    assert out.shape == (B, O), out.shape

    ref = jax.block_until_ready(stock_lstm_ref(x, params, hidden_size=H))
    # Tolerance loosened vs the f32 version because MXU operands are bf16
    # (carries / gate math / LayerNorm / bias adds remain f32).
    assert jnp.allclose(out, ref, rtol=5e-2, atol=5e-2), (out, ref)

    print("KERNEL_OK")
</pallas_src>

<mosaic_0001>
module attributes {stable_mosaic.version = 11 : i64} {
  func.func @_stock_lstm_kernel(%arg0: memref<16x15xbf16, #tpu.memory_space<vmem>>, %arg1: memref<15x128xbf16, #tpu.memory_space<vmem>>, %arg2: memref<1x128xf32, #tpu.memory_space<vmem>>, %arg3: memref<32x128xbf16, #tpu.memory_space<vmem>>, %arg4: memref<32x128xbf16, #tpu.memory_space<vmem>>, %arg5: memref<32x128xbf16, #tpu.memory_space<vmem>>, %arg6: memref<1x128xf32, #tpu.memory_space<vmem>>, %arg7: memref<1x32xf32, #tpu.memory_space<vmem>>, %arg8: memref<1x32xf32, #tpu.memory_space<vmem>>, %arg9: memref<32x16xbf16, #tpu.memory_space<vmem>>, %arg10: memref<1x16xf32, #tpu.memory_space<vmem>>, %arg11: memref<16x1xbf16, #tpu.memory_space<vmem>>, %arg12: memref<1x1xf32, #tpu.memory_space<vmem>>, %arg13: memref<2x1xf32, #tpu.memory_space<vmem>>) attributes {dimension_semantics = [], scalar_prefetch = 0 : i64, scratch_operands = 0 : i64, tpu.core_type = #tpu.core_type<tc>} {
    %c0 = arith.constant 0 : index
    %c0_0 = arith.constant 0 : index
    %0 = vector.load %arg0[%c0, %c0_0] : memref<16x15xbf16, #tpu.memory_space<vmem>>, vector<16x15xbf16>
    %c0_1 = arith.constant 0 : index
    %c0_2 = arith.constant 0 : index
    %1 = vector.load %arg1[%c0_1, %c0_2] : memref<15x128xbf16, #tpu.memory_space<vmem>>, vector<15x128xbf16>
    %cst = arith.constant dense<0.000000e+00> : vector<16x128xf32>
    %2 = tpu.matmul %0, %1, %cst {dimension_numbers = #tpu.dot_dimension_numbers<[1], [0], [0], [1], [0, 0, 1, 1], [], []>} : vector<16x15xbf16>, vector<15x128xbf16>, vector<16x128xf32> -> vector<16x128xf32>
    %c0_3 = arith.constant 0 : index
    %c0_4 = arith.constant 0 : index
    %3 = vector.load %arg2[%c0_3, %c0_4] : memref<1x128xf32, #tpu.memory_space<vmem>>, vector<1x128xf32>
    %4 = vector.broadcast %3 : vector<1x128xf32> to vector<16x128xf32>
    %5 = arith.addf %2, %4 : vector<16x128xf32>
    %c0_5 = arith.constant 0 : index
    %c0_6 = arith.constant 0 : index
    %6 = vector.load %arg3[%c0_5, %c0_6] : memref<32x128xbf16, #tpu.memory_space<vmem>>, vector<32x128xbf16>
    %c0_7 = arith.constant 0 : index
    %c0_8 = arith.constant 0 : index
    %7 = vector.load %arg4[%c0_7, %c0_8] : memref<32x128xbf16, #tpu.memory_space<vmem>>, vector<32x128xbf16>
    %c0_9 = arith.constant 0 : index
    %c0_10 = arith.constant 0 : index
    %8 = vector.load %arg5[%c0_9, %c0_10] : memref<32x128xbf16, #tpu.memory_space<vmem>>, vector<32x128xbf16>
    %c0_11 = arith.constant 0 : index
    %c0_12 = arith.constant 0 : index
    %9 = vector.load %arg6[%c0_11, %c0_12] : memref<1x128xf32, #tpu.memory_space<vmem>>, vector<1x128xf32>
    %10 = vector.shape_cast %9 : vector<1x128xf32> to vector<1x128xf32>
    %11 = vector.broadcast %10 : vector<1x128xf32> to vector<2x128xf32>
    %cst_13 = arith.constant 0.000000e+00 : f32
    %12 = vector.broadcast %cst_13 : f32 to vector<2x32xf32>
    %cst_14 = arith.constant 0.000000e+00 : f32
    %13 = vector.broadcast %cst_14 : f32 to vector<2x32xf32>
    %cst_15 = arith.constant 0.000000e+00 : f32
    %14 = vector.broadcast %cst_15 : f32 to vector<2x32xf32>
    %cst_16 = arith.constant 0.000000e+00 : f32
    %15 = vector.broadcast %cst_16 : f32 to vector<2x32xf32>
    %16 = arith.truncf %14 : vector<2x32xf32> to vector<2x32xbf16>
    %cst_17 = arith.constant dense<0.000000e+00> : vector<2x128xf32>
    %17 = tpu.matmul %16, %8, %cst_17 {dimension_numbers = #tpu.dot_dimension_numbers<[1], [0], [0], [1], [0, 0, 1, 1], [], []>} : vector<2x32xbf16>, vector<32x128xbf16>, vector<2x128xf32> -> vector<2x128xf32>
    %18 = vector.extract_strided_slice %5 {offsets = [0, 0], sizes = [2, 128], strides = [1, 1]} : vector<16x128xf32> to vector<2x128xf32>
    %19 = arith.truncf %12 : vector<2x32xf32> to vector<2x32xbf16>
    %cst_18 = arith.constant dense<0.000000e+00> : vector<2x128xf32>
    %20 = tpu.matmul %19, %6, %cst_18 {dimension_numbers = #tpu.dot_dimension_numbers<[1], [0], [0], [1], [0, 0, 1, 1], [], []>} : vector<2x32xbf16>, vector<32x128xbf16>, vector<2x128xf32> -> vector<2x128xf32>
    %21 = arith.addf %18, %20 : vector<2x128xf32>
    %22 = vector.extract_strided_slice %21 {offsets = [0, 0], sizes = [2, 96], strides = [1, 1]} : vector<2x128xf32> to vector<2x96xf32>
    %23 = arith.negf %22 : vector<2x96xf32>
    %24 = math.exp %23 : vector<2x96xf32>
    %cst_19 = arith.constant 1.000000e+00 : f32
    %25 = vector.broadcast %cst_19 : f32 to vector<2x96xf32>
    %26 = arith.addf %25, %24 : vector<2x96xf32>
    %27 = arith.divf %25, %26 : vector<2x96xf32>
    %28 = vector.extract_strided_slice %21 {offsets = [0, 96], sizes = [2, 32], strides = [1, 1]} : vector<2x128xf32> to vector<2x32xf32>
    %29 = math.tanh %28 : vector<2x32xf32>
    %30 = vector.extract_strided_slice %27 {offsets = [0, 0], sizes = [2, 32], strides = [1, 1]} : vector<2x96xf32> to vector<2x32xf32>
    %31 = vector.extract_strided_slice %27 {offsets = [0, 32], sizes = [2, 32], strides = [1, 1]} : vector<2x96xf32> to vector<2x32xf32>
    %32 = vector.extract_strided_slice %27 {offsets = [0, 64], sizes = [2, 32], strides = [1, 1]} : vector<2x96xf32> to vector<2x32xf32>
    %33 = arith.mulf %31, %13 : vector<2x32xf32>
    %34 = arith.mulf %30, %29 : vector<2x32xf32>
    %35 = arith.addf %33, %34 : vector<2x32xf32>
    %36 = math.tanh %35 : vector<2x32xf32>
    %37 = arith.mulf %32, %36 : vector<2x32xf32>
    %38 = arith.truncf %37 : vector<2x32xf32> to vector<2x32xbf16>
    %cst_20 = arith.constant dense<0.000000e+00> : vector<2x128xf32>
    %39 = tpu.matmul %38, %7, %cst_20 {dimension_numbers = #tpu.dot_dimension_numbers<[1], [0], [0], [1], [0, 0, 1, 1], [], []>} : vector<2x32xbf16>, vector<32x128xbf16>, vector<2x128xf32> -> vector<2x128xf32>
    %40 = arith.addf %39, %17 : vector<2x128xf32>
    %41 = arith.addf %40, %11 : vector<2x128xf32>
    %42 = vector.extract_strided_slice %41 {offsets = [0, 0], sizes = [2, 96], strides = [1, 1]} : vector<2x128xf32> to vector<2x96xf32>
    %43 = arith.negf %42 : vector<2x96xf32>
    %44 = math.exp %43 : vector<2x96xf32>
    %cst_21 = arith.constant 1.000000e+00 : f32
    %45 = vector.broadcast %cst_21 : f32 to vector<2x96xf32>
    %46 = arith.addf %45, %44 : vector<2x96xf32>
    %47 = arith.divf %45, %46 : vector<2x96xf32>
    %48 = vector.extract_strided_slice %41 {offsets = [0, 96], sizes = [2, 32], strides = [1, 1]} : vector<2x128xf32> to vector<2x32xf32>
    %49 = math.tanh %48 : vector<2x32xf32>
    %50 = vector.extract_strided_slice %47 {offsets = [0, 0], sizes = [2, 32], strides = [1, 1]} : vector<2x96xf32> to vector<2x32xf32>
    %51 = vector.extract_strided_slice %47 {offsets = [0, 32], sizes = [2, 32], strides = [1, 1]} : vector<2x96xf32> to vector<2x32xf32>
    %52 = vector.extract_strided_slice %47 {offsets = [0, 64], sizes = [2, 32], strides = [1, 1]} : vector<2x96xf32> to vector<2x32xf32>
    %53 = arith.mulf %51, %15 : vector<2x32xf32>
    %54 = arith.mulf %50, %49 : vector<2x32xf32>
    %55 = arith.addf %53, %54 : vector<2x32xf32>
    %56 = math.tanh %55 : vector<2x32xf32>
    %57 = arith.mulf %52, %56 : vector<2x32xf32>
    %58 = arith.truncf %57 : vector<2x32xf32> to vector<2x32xbf16>
    %cst_22 = arith.constant dense<0.000000e+00> : vector<2x128xf32>
    %59 = tpu.matmul %58, %8, %cst_22 {dimension_numbers = #tpu.dot_dimension_numbers<[1], [0], [0], [1], [0, 0, 1, 1], [], []>} : vector<2x32xbf16>, vector<32x128xbf16>, vector<2x128xf32> -> vector<2x128xf32>
    %60 = vector.extract_strided_slice %5 {offsets = [2, 0], sizes = [2, 128], strides = [1, 1]} : vector<16x128xf32> to vector<2x128xf32>
    %61 = arith.truncf %37 : vector<2x32xf32> to vector<2x32xbf16>
    %cst_23 = arith.constant dense<0.000000e+00> : vector<2x128xf32>
    %62 = tpu.matmul %61, %6, %cst_23 {dimension_numbers = #tpu.dot_dimension_numbers<[1], [0], [0], [1], [0, 0, 1, 1], [], []>} : vector<2x32xbf16>, vector<32x128xbf16>, vector<2x128xf32> -> vector<2x128xf32>
    %63 = arith.addf %60, %62 : vector<2x128xf32>
    %64 = vector.extract_strided_slice %63 {offsets = [0, 0], sizes = [2, 96], strides = [1, 1]} : vector<2x128xf32> to vector<2x96xf32>
    %65 = arith.negf %64 : vector<2x96xf32>
    %66 = math.exp %65 : vector<2x96xf32>
    %cst_24 = arith.constant 1.000000e+00 : f32
    %67 = vector.broadcast %cst_24 : f32 to vector<2x96xf32>
    %68 = arith.addf %67, %66 : vector<2x96xf32>
    %69 = arith.divf %67, %68 : vector<2x96xf32>
    %70 = vector.extract_strided_slice %63 {offsets = [0, 96], sizes = [2, 32], strides = [1, 1]} : vector<2x128xf32> to vector<2x32xf32>
    %71 = math.tanh %70 : vector<2x32xf32>
    %72 = vector.extract_strided_slice %69 {offsets = [0, 0], sizes = [2, 32], strides = [1, 1]} : vector<2x96xf32> to vector<2x32xf32>
    %73 = vector.extract_strided_slice %69 {offsets = [0, 32], sizes = [2, 32], strides = [1, 1]} : vector<2x96xf32> to vector<2x32xf32>
    %74 = vector.extract_strided_slice %69 {offsets = [0, 64], sizes = [2, 32], strides = [1, 1]} : vector<2x96xf32> to vector<2x32xf32>
    %75 = arith.mulf %73, %35 : vector<2x32xf32>
    %76 = arith.mulf %72, %71 : vector<2x32xf32>
    %77 = arith.addf %75, %76 : vector<2x32xf32>
    %78 = math.tanh %77 : vector<2x32xf32>
    %79 = arith.mulf %74, %78 : vector<2x32xf32>
    %80 = arith.truncf %79 : vector<2x32xf32> to vector<2x32xbf16>
    %cst_25 = arith.constant dense<0.000000e+00> : vector<2x128xf32>
    %81 = tpu.matmul %80, %7, %cst_25 {dimension_numbers = #tpu.dot_dimension_numbers<[1], [0], [0], [1], [0, 0, 1, 1], [], []>} : vector<2x32xbf16>, vector<32x128xbf16>, vector<2x128xf32> -> vector<2x128xf32>
    %82 = arith.addf %81, %59 : vector<2x128xf32>
    %83 = arith.addf %82, %11 : vector<2x128xf32>
    %84 = vector.extract_strided_slice %83 {offsets = [0, 0], sizes = [2, 96], strides = [1, 1]} : vector<2x128xf32> to vector<2x96xf32>
    %85 = arith.negf %84 : vector<2x96xf32>
    %86 = math.exp %85 : vector<2x96xf32>
    %cst_26 = arith.constant 1.000000e+00 : f32
    %87 = vector.broadcast %cst_26 : f32 to vector<2x96xf32>
    %88 = arith.addf %87, %86 : vector<2x96xf32>
    %89 = arith.divf %87, %88 : vector<2x96xf32>
    %90 = vector.extract_strided_slice %83 {offsets = [0, 96], sizes = [2, 32], strides = [1, 1]} : vector<2x128xf32> to vector<2x32xf32>
    %91 = math.tanh %90 : vector<2x32xf32>
    %92 = vector.extract_strided_slice %89 {offsets = [0, 0], sizes = [2, 32], strides = [1, 1]} : vector<2x96xf32> to vector<2x32xf32>
    %93 = vector.extract_strided_slice %89 {offsets = [0, 32], sizes = [2, 32], strides = [1, 1]} : vector<2x96xf32> to vector<2x32xf32>
    %94 = vector.extract_strided_slice %89 {offsets = [0, 64], sizes = [2, 32], strides = [1, 1]} : vector<2x96xf32> to vector<2x32xf32>
    %95 = arith.mulf %93, %55 : vector<2x32xf32>
    %96 = arith.mulf %92, %91 : vector<2x32xf32>
    %97 = arith.addf %95, %96 : vector<2x32xf32>
    %98 = math.tanh %97 : vector<2x32xf32>
    %99 = arith.mulf %94, %98 : vector<2x32xf32>
    %100 = arith.truncf %99 : vector<2x32xf32> to vector<2x32xbf16>
    %cst_27 = arith.constant dense<0.000000e+00> : vector<2x128xf32>
    %101 = tpu.matmul %100, %8, %cst_27 {dimension_numbers = #tpu.dot_dimension_numbers<[1], [0], [0], [1], [0, 0, 1, 1], [], []>} : vector<2x32xbf16>, vector<32x128xbf16>, vector<2x128xf32> -> vector<2x128xf32>
    %102 = vector.extract_strided_slice %5 {offsets = [4, 0], sizes = [2, 128], strides = [1, 1]} : vector<16x128xf32> to vector<2x128xf32>
    %103 = arith.truncf %79 : vector<2x32xf32> to vector<2x32xbf16>
    %cst_28 = arith.constant dense<0.000000e+00> : vector<2x128xf32>
    %104 = tpu.matmul %103, %6, %cst_28 {dimension_numbers = #tpu.dot_dimension_numbers<[1], [0], [0], [1], [0, 0, 1, 1], [], []>} : vector<2x32xbf16>, vector<32x128xbf16>, vector<2x128xf32> -> vector<2x128xf32>
    %105 = arith.addf %102, %104 : vector<2x128xf32>
    %106 = vector.extract_strided_slice %105 {offsets = [0, 0], sizes = [2, 96], strides = [1, 1]} : vector<2x128xf32> to vector<2x96xf32>
    %107 = arith.negf %106 : vector<2x96xf32>
    %108 = math.exp %107 : vector<2x96xf32>
    %cst_29 = arith.constant 1.000000e+00 : f32
    %109 = vector.broadcast %cst_29 : f32 to vector<2x96xf32>
    %110 = arith.addf %109, %108 : vector<2x96xf32>
    %111 = arith.divf %109, %110 : vector<2x96xf32>
    %112 = vector.extract_strided_slice %105 {offsets = [0, 96], sizes = [2, 32], strides = [1, 1]} : vector<2x128xf32> to vector<2x32xf32>
    %113 = math.tanh %112 : vector<2x32xf32>
    %114 = vector.extract_strided_slice %111 {offsets = [0, 0], sizes = [2, 32], strides = [1, 1]} : vector<2x96xf32> to vector<2x32xf32>
    %115 = vector.extract_strided_slice %111 {offsets = [0, 32], sizes = [2, 32], strides = [1, 1]} : vector<2x96xf32> to vector<2x32xf32>
    %116 = vector.extract_strided_slice %111 {offsets = [0, 64], sizes = [2, 32], strides = [1, 1]} : vector<2x96xf32> to vector<2x32xf32>
    %117 = arith.mulf %115, %77 : vector<2x32xf32>
    %118 = arith.mulf %114, %113 : vector<2x32xf32>
    %119 = arith.addf %117, %118 : vector<2x32xf32>
    %120 = math.tanh %119 : vector<2x32xf32>
    %121 = arith.mulf %116, %120 : vector<2x32xf32>
    %122 = arith.truncf %121 : vector<2x32xf32> to vector<2x32xbf16>
    %cst_30 = arith.constant dense<0.000000e+00> : vector<2x128xf32>
    %123 = tpu.matmul %122, %7, %cst_30 {dimension_numbers = #tpu.dot_dimension_numbers<[1], [0], [0], [1], [0, 0, 1, 1], [], []>} : vector<2x32xbf16>, vector<32x128xbf16>, vector<2x128xf32> -> vector<2x128xf32>
    %124 = arith.addf %123, %101 : vector<2x128xf32>
    %125 = arith.addf %124, %11 : vector<2x128xf32>
    %126 = vector.extract_strided_slice %125 {offsets = [0, 0], sizes = [2, 96], strides = [1, 1]} : vector<2x128xf32> to vector<2x96xf32>
    %127 = arith.negf %126 : vector<2x96xf32>
    %128 = math.exp %127 : vector<2x96xf32>
    %cst_31 = arith.constant 1.000000e+00 : f32
    %129 = vector.broadcast %cst_31 : f32 to vector<2x96xf32>
    %130 = arith.addf %129, %128 : vector<2x96xf32>
    %131 = arith.divf %129, %130 : vector<2x96xf32>
    %132 = vector.extract_strided_slice %125 {offsets = [0, 96], sizes = [2, 32], strides = [1, 1]} : vector<2x128xf32> to vector<2x32xf32>
    %133 = math.tanh %132 : vector<2x32xf32>
    %134 = vector.extract_strided_slice %131 {offsets = [0, 0], sizes = [2, 32], strides = [1, 1]} : vector<2x96xf32> to vector<2x32xf32>
    %135 = vector.extract_strided_slice %131 {offsets = [0, 32], sizes = [2, 32], strides = [1, 1]} : vector<2x96xf32> to vector<2x32xf32>
    %136 = vector.extract_strided_slice %131 {offsets = [0, 64], sizes = [2, 32], strides = [1, 1]} : vector<2x96xf32> to vector<2x32xf32>
    %137 = arith.mulf %135, %97 : vector<2x32xf32>
    %138 = arith.mulf %134, %133 : vector<2x32xf32>
    %139 = arith.addf %137, %138 : vector<2x32xf32>
    %140 = math.tanh %139 : vector<2x32xf32>
    %141 = arith.mulf %136, %140 : vector<2x32xf32>
    %142 = arith.truncf %141 : vector<2x32xf32> to vector<2x32xbf16>
    %cst_32 = arith.constant dense<0.000000e+00> : vector<2x128xf32>
    %143 = tpu.matmul %142, %8, %cst_32 {dimension_numbers = #tpu.dot_dimension_numbers<[1], [0], [0], [1], [0, 0, 1, 1], [], []>} : vector<2x32xbf16>, vector<32x128xbf16>, vector<2x128xf32> -> vector<2x128xf32>
    %144 = vector.extract_strided_slice %5 {offsets = [6, 0], sizes = [2, 128], strides = [1, 1]} : vector<16x128xf32> to vector<2x128xf32>
    %145 = arith.truncf %121 : vector<2x32xf32> to vector<2x32xbf16>
    %cst_33 = arith.constant dense<0.000000e+00> : vector<2x128xf32>
    %146 = tpu.matmul %145, %6, %cst_33 {dimension_numbers = #tpu.dot_dimension_numbers<[1], [0], [0], [1], [0, 0, 1, 1], [], []>} : vector<2x32xbf16>, vector<32x128xbf16>, vector<2x128xf32> -> vector<2x128xf32>
    %147 = arith.addf %144, %146 : vector<2x128xf32>
    %148 = vector.extract_strided_slice %147 {offsets = [0, 0], sizes = [2, 96], strides = [1, 1]} : vector<2x128xf32> to vector<2x96xf32>
    %149 = arith.negf %148 : vector<2x96xf32>
    %150 = math.exp %149 : vector<2x96xf32>
    %cst_34 = arith.constant 1.000000e+00 : f32
    %151 = vector.broadcast %cst_34 : f32 to vector<2x96xf32>
    %152 = arith.addf %151, %150 : vector<2x96xf32>
    %153 = arith.divf %151, %152 : vector<2x96xf32>
    %154 = vector.extract_strided_slice %147 {offsets = [0, 96], sizes = [2, 32], strides = [1, 1]} : vector<2x128xf32> to vector<2x32xf32>
    %155 = math.tanh %154 : vector<2x32xf32>
    %156 = vector.extract_strided_slice %153 {offsets = [0, 0], sizes = [2, 32], strides = [1, 1]} : vector<2x96xf32> to vector<2x32xf32>
    %157 = vector.extract_strided_slice %153 {offsets = [0, 32], sizes = [2, 32], strides = [1, 1]} : vector<2x96xf32> to vector<2x32xf32>
    %158 = vector.extract_strided_slice %153 {offsets = [0, 64], sizes = [2, 32], strides = [1, 1]} : vector<2x96xf32> to vector<2x32xf32>
    %159 = arith.mulf %157, %119 : vector<2x32xf32>
    %160 = arith.mulf %156, %155 : vector<2x32xf32>
    %161 = arith.addf %159, %160 : vector<2x32xf32>
    %162 = math.tanh %161 : vector<2x32xf32>
    %163 = arith.mulf %158, %162 : vector<2x32xf32>
    %164 = arith.truncf %163 : vector<2x32xf32> to vector<2x32xbf16>
    %cst_35 = arith.constant dense<0.000000e+00> : vector<2x128xf32>
    %165 = tpu.matmul %164, %7, %cst_35 {dimension_numbers = #tpu.dot_dimension_numbers<[1], [0], [0], [1], [0, 0, 1, 1], [], []>} : vector<2x32xbf16>, vector<32x128xbf16>, vector<2x128xf32> -> vector<2x128xf32>
    %166 = arith.addf %165, %143 : vector<2x128xf32>
    %167 = arith.addf %166, %11 : vector<2x128xf32>
    %168 = vector.extract_strided_slice %167 {offsets = [0, 0], sizes = [2, 96], strides = [1, 1]} : vector<2x128xf32> to vector<2x96xf32>
    %169 = arith.negf %168 : vector<2x96xf32>
    %170 = math.exp %169 : vector<2x96xf32>
    %cst_36 = arith.constant 1.000000e+00 : f32
    %171 = vector.broadcast %cst_36 : f32 to vector<2x96xf32>
    %172 = arith.addf %171, %170 : vector<2x96xf32>
    %173 = arith.divf %171, %172 : vector<2x96xf32>
    %174 = vector.extract_strided_slice %167 {offsets = [0, 96], sizes = [2, 32], strides = [1, 1]} : vector<2x128xf32> to vector<2x32xf32>
    %175 = math.tanh %174 : vector<2x32xf32>
    %176 = vector.extract_strided_slice %173 {offsets = [0, 0], sizes = [2, 32], strides = [1, 1]} : vector<2x96xf32> to vector<2x32xf32>
    %177 = vector.extract_strided_slice %173 {offsets = [0, 32], sizes = [2, 32], strides = [1, 1]} : vector<2x96xf32> to vector<2x32xf32>
    %178 = vector.extract_strided_slice %173 {offsets = [0, 64], sizes = [2, 32], strides = [1, 1]} : vector<2x96xf32> to vector<2x32xf32>
    %179 = arith.mulf %177, %139 : vector<2x32xf32>
    %180 = arith.mulf %176, %175 : vector<2x32xf32>
    %181 = arith.addf %179, %180 : vector<2x32xf32>
    %182 = math.tanh %181 : vector<2x32xf32>
    %183 = arith.mulf %178, %182 : vector<2x32xf32>
    %184 = arith.truncf %183 : vector<2x32xf32> to vector<2x32xbf16>
    %cst_37 = arith.constant dense<0.000000e+00> : vector<2x128xf32>
    %185 = tpu.matmul %184, %8, %cst_37 {dimension_numbers = #tpu.dot_dimension_numbers<[1], [0], [0], [1], [0, 0, 1, 1], [], []>} : vector<2x32xbf16>, vector<32x128xbf16>, vector<2x128xf32> -> vector<2x128xf32>
    %186 = vector.extract_strided_slice %5 {offsets = [8, 0], sizes = [2, 128], strides = [1, 1]} : vector<16x128xf32> to vector<2x128xf32>
    %187 = arith.truncf %163 : vector<2x32xf32> to vector<2x32xbf16>
    %cst_38 = arith.constant dense<0.000000e+00> : vector<2x128xf32>
    %188 = tpu.matmul %187, %6, %cst_38 {dimension_numbers = #tpu.dot_dimension_numbers<[1], [0], [0], [1], [0, 0, 1, 1], [], []>} : vector<2x32xbf16>, vector<32x128xbf16>, vector<2x128xf32> -> vector<2x128xf32>
    %189 = arith.addf %186, %188 : vector<2x128xf32>
    %190 = vector.extract_strided_slice %189 {offsets = [0, 0], sizes = [2, 96], strides = [1, 1]} : vector<2x128xf32> to vector<2x96xf32>
    %191 = arith.negf %190 : vector<2x96xf32>
    %192 = math.exp %191 : vector<2x96xf32>
    %cst_39 = arith.constant 1.000000e+00 : f32
    %193 = vector.broadcast %cst_39 : f32 to vector<2x96xf32>
    %194 = arith.addf %193, %192 : vector<2x96xf32>
    %195 = arith.divf %193, %194 : vector<2x96xf32>
    %196 = vector.extract_strided_slice %189 {offsets = [0, 96], sizes = [2, 32], strides = [1, 1]} : vector<2x128xf32> to vector<2x32xf32>
    %197 = math.tanh %196 : vector<2x32xf32>
    %198 = vector.extract_strided_slice %195 {offsets = [0, 0], sizes = [2, 32], strides = [1, 1]} : vector<2x96xf32> to vector<2x32xf32>
    %199 = vector.extract_strided_slice %195 {offsets = [0, 32], sizes = [2, 32], strides = [1, 1]} : vector<2x96xf32> to vector<2x32xf32>
    %200 = vector.extract_strided_slice %195 {offsets = [0, 64], sizes = [2, 32], strides = [1, 1]} : vector<2x96xf32> to vector<2x32xf32>
    %201 = arith.mulf %199, %161 : vector<2x32xf32>
    %202 = arith.mulf %198, %197 : vector<2x32xf32>
    %203 = arith.addf %201, %202 : vector<2x32xf32>
    %204 = math.tanh %203 : vector<2x32xf32>
    %205 = arith.mulf %200, %204 : vector<2x32xf32>
    %206 = arith.truncf %205 : vector<2x32xf32> to vector<2x32xbf16>
    %cst_40 = arith.constant dense<0.000000e+00> : vector<2x128xf32>
    %207 = tpu.matmul %206, %7, %cst_40 {dimension_numbers = #tpu.dot_dimension_numbers<[1], [0], [0], [1], [0, 0, 1, 1], [], []>} : vector<2x32xbf16>, vector<32x128xbf16>, vector<2x128xf32> -> vector<2x128xf32>
    %208 = arith.addf %207, %185 : vector<2x128xf32>
    %209 = arith.addf %208, %11 : vector<2x128xf32>
    %210 = vector.extract_strided_slice %209 {offsets = [0, 0], sizes = [2, 96], strides = [1, 1]} : vector<2x128xf32> to vector<2x96xf32>
    %211 = arith.negf %210 : vector<2x96xf32>
    %212 = math.exp %211 : vector<2x96xf32>
    %cst_41 = arith.constant 1.000000e+00 : f32
    %213 = vector.broadcast %cst_41 : f32 to vector<2x96xf32>
    %214 = arith.addf %213, %212 : vector<2x96xf32>
    %215 = arith.divf %213, %214 : vector<2x96xf32>
    %216 = vector.extract_strided_slice %209 {offsets = [0, 96], sizes = [2, 32], strides = [1, 1]} : vector<2x128xf32> to vector<2x32xf32>
    %217 = math.tanh %216 : vector<2x32xf32>
    %218 = vector.extract_strided_slice %215 {offsets = [0, 0], sizes = [2, 32], strides = [1, 1]} : vector<2x96xf32> to vector<2x32xf32>
    %219 = vector.extract_strided_slice %215 {offsets = [0, 32], sizes = [2, 32], strides = [1, 1]} : vector<2x96xf32> to vector<2x32xf32>
    %220 = vector.extract_strided_slice %215 {offsets = [0, 64], sizes = [2, 32], strides = [1, 1]} : vector<2x96xf32> to vector<2x32xf32>
    %221 = arith.mulf %219, %181 : vector<2x32xf32>
    %222 = arith.mulf %218, %217 : vector<2x32xf32>
    %223 = arith.addf %221, %222 : vector<2x32xf32>
    %224 = math.tanh %223 : vector<2x32xf32>
    %225 = arith.mulf %220, %224 : vector<2x32xf32>
    %226 = arith.truncf %225 : vector<2x32xf32> to vector<2x32xbf16>
    %cst_42 = arith.constant dense<0.000000e+00> : vector<2x128xf32>
    %227 = tpu.matmul %226, %8, %cst_42 {dimension_numbers = #tpu.dot_dimension_numbers<[1], [0], [0], [1], [0, 0, 1, 1], [], []>} : vector<2x32xbf16>, vector<32x128xbf16>, vector<2x128xf32> -> vector<2x128xf32>
    %228 = vector.extract_strided_slice %5 {offsets = [10, 0], sizes = [2, 128], strides = [1, 1]} : vector<16x128xf32> to vector<2x128xf32>
    %229 = arith.truncf %205 : vector<2x32xf32> to vector<2x32xbf16>
    %cst_43 = arith.constant dense<0.000000e+00> : vector<2x128xf32>
    %230 = tpu.matmul %229, %6, %cst_43 {dimension_numbers = #tpu.dot_dimension_numbers<[1], [0], [0], [1], [0, 0, 1, 1], [], []>} : vector<2x32xbf16>, vector<32x128xbf16>, vector<2x128xf32> -> vector<2x128xf32>
    %231 = arith.addf %228, %230 : vector<2x128xf32>
    %232 = vector.extract_strided_slice %231 {offsets = [0, 0], sizes = [2, 96], strides = [1, 1]} : vector<2x128xf32> to vector<2x96xf32>
    %233 = arith.negf %232 : vector<2x96xf32>
    %234 = math.exp %233 : vector<2x96xf32>
    %cst_44 = arith.constant 1.000000e+00 : f32
    %235 = vector.broadcast %cst_44 : f32 to vector<2x96xf32>
    %236 = arith.addf %235, %234 : vector<2x96xf32>
    %237 = arith.divf %235, %236 : vector<2x96xf32>
    %238 = vector.extract_strided_slice %231 {offsets = [0, 96], sizes = [2, 32], strides = [1, 1]} : vector<2x128xf32> to vector<2x32xf32>
    %239 = math.tanh %238 : vector<2x32xf32>
    %240 = vector.extract_strided_slice %237 {offsets = [0, 0], sizes = [2, 32], strides = [1, 1]} : vector<2x96xf32> to vector<2x32xf32>
    %241 = vector.extract_strided_slice %237 {offsets = [0, 32], sizes = [2, 32], strides = [1, 1]} : vector<2x96xf32> to vector<2x32xf32>
    %242 = vector.extract_strided_slice %237 {offsets = [0, 64], sizes = [2, 32], strides = [1, 1]} : vector<2x96xf32> to vector<2x32xf32>
    %243 = arith.mulf %241, %203 : vector<2x32xf32>
    %244 = arith.mulf %240, %239 : vector<2x32xf32>
    %245 = arith.addf %243, %244 : vector<2x32xf32>
    %246 = math.tanh %245 : vector<2x32xf32>
    %247 = arith.mulf %242, %246 : vector<2x32xf32>
    %248 = arith.truncf %247 : vector<2x32xf32> to vector<2x32xbf16>
    %cst_45 = arith.constant dense<0.000000e+00> : vector<2x128xf32>
    %249 = tpu.matmul %248, %7, %cst_45 {dimension_numbers = #tpu.dot_dimension_numbers<[1], [0], [0], [1], [0, 0, 1, 1], [], []>} : vector<2x32xbf16>, vector<32x128xbf16>, vector<2x128xf32> -> vector<2x128xf32>
    %250 = arith.addf %249, %227 : vector<2x128xf32>
    %251 = arith.addf %250, %11 : vector<2x128xf32>
    %252 = vector.extract_strided_slice %251 {offsets = [0, 0], sizes = [2, 96], strides = [1, 1]} : vector<2x128xf32> to vector<2x96xf32>
    %253 = arith.negf %252 : vector<2x96xf32>
    %254 = math.exp %253 : vector<2x96xf32>
    %cst_46 = arith.constant 1.000000e+00 : f32
    %255 = vector.broadcast %cst_46 : f32 to vector<2x96xf32>
    %256 = arith.addf %255, %254 : vector<2x96xf32>
    %257 = arith.divf %255, %256 : vector<2x96xf32>
    %258 = vector.extract_strided_slice %251 {offsets = [0, 96], sizes = [2, 32], strides = [1, 1]} : vector<2x128xf32> to vector<2x32xf32>
    %259 = math.tanh %258 : vector<2x32xf32>
    %260 = vector.extract_strided_slice %257 {offsets = [0, 0], sizes = [2, 32], strides = [1, 1]} : vector<2x96xf32> to vector<2x32xf32>
    %261 = vector.extract_strided_slice %257 {offsets = [0, 32], sizes = [2, 32], strides = [1, 1]} : vector<2x96xf32> to vector<2x32xf32>
    %262 = vector.extract_strided_slice %257 {offsets = [0, 64], sizes = [2, 32], strides = [1, 1]} : vector<2x96xf32> to vector<2x32xf32>
    %263 = arith.mulf %261, %223 : vector<2x32xf32>
    %264 = arith.mulf %260, %259 : vector<2x32xf32>
    %265 = arith.addf %263, %264 : vector<2x32xf32>
    %266 = math.tanh %265 : vector<2x32xf32>
    %267 = arith.mulf %262, %266 : vector<2x32xf32>
    %268 = arith.truncf %267 : vector<2x32xf32> to vector<2x32xbf16>
    %cst_47 = arith.constant dense<0.000000e+00> : vector<2x128xf32>
    %269 = tpu.matmul %268, %8, %cst_47 {dimension_numbers = #tpu.dot_dimension_numbers<[1], [0], [0], [1], [0, 0, 1, 1], [], []>} : vector<2x32xbf16>, vector<32x128xbf16>, vector<2x128xf32> -> vector<2x128xf32>
    %270 = vector.extract_strided_slice %5 {offsets = [12, 0], sizes = [2, 128], strides = [1, 1]} : vector<16x128xf32> to vector<2x128xf32>
    %271 = arith.truncf %247 : vector<2x32xf32> to vector<2x32xbf16>
    %cst_48 = arith.constant dense<0.000000e+00> : vector<2x128xf32>
    %272 = tpu.matmul %271, %6, %cst_48 {dimension_numbers = #tpu.dot_dimension_numbers<[1], [0], [0], [1], [0, 0, 1, 1], [], []>} : vector<2x32xbf16>, vector<32x128xbf16>, vector<2x128xf32> -> vector<2x128xf32>
    %273 = arith.addf %270, %272 : vector<2x128xf32>
    %274 = vector.extract_strided_slice %273 {offsets = [0, 0], sizes = [2, 96], strides = [1, 1]} : vector<2x128xf32> to vector<2x96xf32>
    %275 = arith.negf %274 : vector<2x96xf32>
    %276 = math.exp %275 : vector<2x96xf32>
    %cst_49 = arith.constant 1.000000e+00 : f32
    %277 = vector.broadcast %cst_49 : f32 to vector<2x96xf32>
    %278 = arith.addf %277, %276 : vector<2x96xf32>
    %279 = arith.divf %277, %278 : vector<2x96xf32>
    %280 = vector.extract_strided_slice %273 {offsets = [0, 96], sizes = [2, 32], strides = [1, 1]} : vector<2x128xf32> to vector<2x32xf32>
    %281 = math.tanh %280 : vector<2x32xf32>
    %282 = vector.extract_strided_slice %279 {offsets = [0, 0], sizes = [2, 32], strides = [1, 1]} : vector<2x96xf32> to vector<2x32xf32>
    %283 = vector.extract_strided_slice %279 {offsets = [0, 32], sizes = [2, 32], strides = [1, 1]} : vector<2x96xf32> to vector<2x32xf32>
    %284 = vector.extract_strided_slice %279 {offsets = [0, 64], sizes = [2, 32], strides = [1, 1]} : vector<2x96xf32> to vector<2x32xf32>
    %285 = arith.mulf %283, %245 : vector<2x32xf32>
    %286 = arith.mulf %282, %281 : vector<2x32xf32>
    %287 = arith.addf %285, %286 : vector<2x32xf32>
    %288 = math.tanh %287 : vector<2x32xf32>
    %289 = arith.mulf %284, %288 : vector<2x32xf32>
    %290 = arith.truncf %289 : vector<2x32xf32> to vector<2x32xbf16>
    %cst_50 = arith.constant dense<0.000000e+00> : vector<2x128xf32>
    %291 = tpu.matmul %290, %7, %cst_50 {dimension_numbers = #tpu.dot_dimension_numbers<[1], [0], [0], [1], [0, 0, 1, 1], [], []>} : vector<2x32xbf16>, vector<32x128xbf16>, vector<2x128xf32> -> vector<2x128xf32>
    %292 = arith.addf %291, %269 : vector<2x128xf32>
    %293 = arith.addf %292, %11 : vector<2x128xf32>
    %294 = vector.extract_strided_slice %293 {offsets = [0, 0], sizes = [2, 96], strides = [1, 1]} : vector<2x128xf32> to vector<2x96xf32>
    %295 = arith.negf %294 : vector<2x96xf32>
    %296 = math.exp %295 : vector<2x96xf32>
    %cst_51 = arith.constant 1.000000e+00 : f32
    %297 = vector.broadcast %cst_51 : f32 to vector<2x96xf32>
    %298 = arith.addf %297, %296 : vector<2x96xf32>
    %299 = arith.divf %297, %298 : vector<2x96xf32>
    %300 = vector.extract_strided_slice %293 {offsets = [0, 96], sizes = [2, 32], strides = [1, 1]} : vector<2x128xf32> to vector<2x32xf32>
    %301 = math.tanh %300 : vector<2x32xf32>
    %302 = vector.extract_strided_slice %299 {offsets = [0, 0], sizes = [2, 32], strides = [1, 1]} : vector<2x96xf32> to vector<2x32xf32>
    %303 = vector.extract_strided_slice %299 {offsets = [0, 32], sizes = [2, 32], strides = [1, 1]} : vector<2x96xf32> to vector<2x32xf32>
    %304 = vector.extract_strided_slice %299 {offsets = [0, 64], sizes = [2, 32], strides = [1, 1]} : vector<2x96xf32> to vector<2x32xf32>
    %305 = arith.mulf %303, %265 : vector<2x32xf32>
    %306 = arith.mulf %302, %301 : vector<2x32xf32>
    %307 = arith.addf %305, %306 : vector<2x32xf32>
    %308 = math.tanh %307 : vector<2x32xf32>
    %309 = arith.mulf %304, %308 : vector<2x32xf32>
    %310 = arith.truncf %309 : vector<2x32xf32> to vector<2x32xbf16>
    %cst_52 = arith.constant dense<0.000000e+00> : vector<2x128xf32>
    %311 = tpu.matmul %310, %8, %cst_52 {dimension_numbers = #tpu.dot_dimension_numbers<[1], [0], [0], [1], [0, 0, 1, 1], [], []>} : vector<2x32xbf16>, vector<32x128xbf16>, vector<2x128xf32> -> vector<2x128xf32>
    %312 = vector.extract_strided_slice %5 {offsets = [14, 0], sizes = [2, 128], strides = [1, 1]} : vector<16x128xf32> to vector<2x128xf32>
    %313 = arith.truncf %289 : vector<2x32xf32> to vector<2x32xbf16>
    %cst_53 = arith.constant dense<0.000000e+00> : vector<2x128xf32>
    %314 = tpu.matmul %313, %6, %cst_53 {dimension_numbers = #tpu.dot_dimension_numbers<[1], [0], [0], [1], [0, 0, 1, 1], [], []>} : vector<2x32xbf16>, vector<32x128xbf16>, vector<2x128xf32> -> vector<2x128xf32>
    %315 = arith.addf %312, %314 : vector<2x128xf32>
    %316 = vector.extract_strided_slice %315 {offsets = [0, 0], sizes = [2, 96], strides = [1, 1]} : vector<2x128xf32> to vector<2x96xf32>
    %317 = arith.negf %316 : vector<2x96xf32>
    %318 = math.exp %317 : vector<2x96xf32>
    %cst_54 = arith.constant 1.000000e+00 : f32
    %319 = vector.broadcast %cst_54 : f32 to vector<2x96xf32>
    %320 = arith.addf %319, %318 : vector<2x96xf32>
    %321 = arith.divf %319, %320 : vector<2x96xf32>
    %322 = vector.extract_strided_slice %315 {offsets = [0, 96], sizes = [2, 32], strides = [1, 1]} : vector<2x128xf32> to vector<2x32xf32>
    %323 = math.tanh %322 : vector<2x32xf32>
    %324 = vector.extract_strided_slice %321 {offsets = [0, 0], sizes = [2, 32], strides = [1, 1]} : vector<2x96xf32> to vector<2x32xf32>
    %325 = vector.extract_strided_slice %321 {offsets = [0, 32], sizes = [2, 32], strides = [1, 1]} : vector<2x96xf32> to vector<2x32xf32>
    %326 = vector.extract_strided_slice %321 {offsets = [0, 64], sizes = [2, 32], strides = [1, 1]} : vector<2x96xf32> to vector<2x32xf32>
    %327 = arith.mulf %325, %287 : vector<2x32xf32>
    %328 = arith.mulf %324, %323 : vector<2x32xf32>
    %329 = arith.addf %327, %328 : vector<2x32xf32>
    %330 = math.tanh %329 : vector<2x32xf32>
    %331 = arith.mulf %326, %330 : vector<2x32xf32>
    %332 = arith.truncf %331 : vector<2x32xf32> to vector<2x32xbf16>
    %cst_55 = arith.constant dense<0.000000e+00> : vector<2x128xf32>
    %333 = tpu.matmul %332, %7, %cst_55 {dimension_numbers = #tpu.dot_dimension_numbers<[1], [0], [0], [1], [0, 0, 1, 1], [], []>} : vector<2x32xbf16>, vector<32x128xbf16>, vector<2x128xf32> -> vector<2x128xf32>
    %334 = arith.addf %333, %311 : vector<2x128xf32>
    %335 = arith.addf %334, %11 : vector<2x128xf32>
    %336 = vector.extract_strided_slice %335 {offsets = [0, 0], sizes = [2, 96], strides = [1, 1]} : vector<2x128xf32> to vector<2x96xf32>
    %337 = arith.negf %336 : vector<2x96xf32>
    %338 = math.exp %337 : vector<2x96xf32>
    %cst_56 = arith.constant 1.000000e+00 : f32
    %339 = vector.broadcast %cst_56 : f32 to vector<2x96xf32>
    %340 = arith.addf %339, %338 : vector<2x96xf32>
    %341 = arith.divf %339, %340 : vector<2x96xf32>
    %342 = vector.extract_strided_slice %335 {offsets = [0, 96], sizes = [2, 32], strides = [1, 1]} : vector<2x128xf32> to vector<2x32xf32>
    %343 = math.tanh %342 : vector<2x32xf32>
    %344 = vector.extract_strided_slice %341 {offsets = [0, 0], sizes = [2, 32], strides = [1, 1]} : vector<2x96xf32> to vector<2x32xf32>
    %345 = vector.extract_strided_slice %341 {offsets = [0, 32], sizes = [2, 32], strides = [1, 1]} : vector<2x96xf32> to vector<2x32xf32>
    %346 = vector.extract_strided_slice %341 {offsets = [0, 64], sizes = [2, 32], strides = [1, 1]} : vector<2x96xf32> to vector<2x32xf32>
    %347 = arith.mulf %345, %307 : vector<2x32xf32>
    %348 = arith.mulf %344, %343 : vector<2x32xf32>
    %349 = arith.addf %347, %348 : vector<2x32xf32>
    %350 = math.tanh %349 : vector<2x32xf32>
    %351 = arith.mulf %346, %350 : vector<2x32xf32>
    %cst_57 = arith.constant dense<0.000000e+00> : vector<2xf32>
    %352 = vector.multi_reduction <add>, %351, %cst_57 [1] : vector<2x32xf32> to vector<2xf32>
    %353 = vector.shape_cast %352 : vector<2xf32> to vector<2x1xf32>
    %cst_58 = arith.constant 3.200000e+01 : f32
    %354 = vector.broadcast %cst_58 : f32 to vector<2x1xf32>
    %355 = arith.divf %353, %354 : vector<2x1xf32>
    %356 = vector.broadcast %355 : vector<2x1xf32> to vector<2x32xf32>
    %357 = arith.subf %351, %356 : vector<2x32xf32>
    %358 = arith.mulf %357, %357 : vector<2x32xf32>
    %cst_59 = arith.constant dense<0.000000e+00> : vector<2xf32>
    %359 = vector.multi_reduction <add>, %358, %cst_59 [1] : vector<2x32xf32> to vector<2xf32>
    %360 = vector.shape_cast %359 : vector<2xf32> to vector<2x1xf32>
    %cst_60 = arith.constant 3.200000e+01 : f32
    %361 = vector.broadcast %cst_60 : f32 to vector<2x1xf32>
    %362 = arith.divf %360, %361 : vector<2x1xf32>
    %363 = vector.broadcast %355 : vector<2x1xf32> to vector<2x32xf32>
    %364 = arith.subf %351, %363 : vector<2x32xf32>
    %cst_61 = arith.constant 9.99999974E-6 : f32
    %365 = vector.broadcast %cst_61 : f32 to vector<2x1xf32>
    %366 = arith.addf %362, %365 : vector<2x1xf32>
    %367 = math.rsqrt %366 : vector<2x1xf32>
    %368 = vector.broadcast %367 : vector<2x1xf32> to vector<2x32xf32>
    %369 = arith.mulf %364, %368 : vector<2x32xf32>
    %c0_62 = arith.constant 0 : index
    %c0_63 = arith.constant 0 : index
    %370 = vector.load %arg7[%c0_62, %c0_63] : memref<1x32xf32, #tpu.memory_space<vmem>>, vector<1x32xf32>
    %371 = vector.broadcast %370 : vector<1x32xf32> to vector<2x32xf32>
    %372 = arith.mulf %369, %371 : vector<2x32xf32>
    %c0_64 = arith.constant 0 : index
    %c0_65 = arith.constant 0 : index
    %373 = vector.load %arg8[%c0_64, %c0_65] : memref<1x32xf32, #tpu.memory_space<vmem>>, vector<1x32xf32>
    %374 = vector.broadcast %373 : vector<1x32xf32> to vector<2x32xf32>
    %375 = arith.addf %372, %374 : vector<2x32xf32>
    %376 = arith.truncf %375 : vector<2x32xf32> to vector<2x32xbf16>
    %c0_66 = arith.constant 0 : index
    %c0_67 = arith.constant 0 : index
    %377 = vector.load %arg9[%c0_66, %c0_67] : memref<32x16xbf16, #tpu.memory_space<vmem>>, vector<32x16xbf16>
    %cst_68 = arith.constant dense<0.000000e+00> : vector<2x16xf32>
    %378 = tpu.matmul %376, %377, %cst_68 {dimension_numbers = #tpu.dot_dimension_numbers<[1], [0], [0], [1], [0, 0, 1, 1], [], []>} : vector<2x32xbf16>, vector<32x16xbf16>, vector<2x16xf32> -> vector<2x16xf32>
    %c0_69 = arith.constant 0 : index
    %c0_70 = arith.constant 0 : index
    %379 = vector.load %arg10[%c0_69, %c0_70] : memref<1x16xf32, #tpu.memory_space<vmem>>, vector<1x16xf32>
    %380 = vector.broadcast %379 : vector<1x16xf32> to vector<2x16xf32>
    %381 = arith.addf %378, %380 : vector<2x16xf32>
    %cst_71 = arith.constant 0.000000e+00 : f32
    %382 = vector.broadcast %cst_71 : f32 to vector<2x16xf32>
    %383 = arith.maximumf %381, %382 : vector<2x16xf32>
    %384 = arith.truncf %383 : vector<2x16xf32> to vector<2x16xbf16>
    %c0_72 = arith.constant 0 : index
    %c0_73 = arith.constant 0 : index
    %385 = vector.load %arg11[%c0_72, %c0_73] : memref<16x1xbf16, #tpu.memory_space<vmem>>, vector<16x1xbf16>
    %cst_74 = arith.constant dense<0.000000e+00> : vector<2x1xf32>
    %386 = tpu.matmul %384, %385, %cst_74 {dimension_numbers = #tpu.dot_dimension_numbers<[1], [0], [0], [1], [0, 0, 1, 1], [], []>} : vector<2x16xbf16>, vector<16x1xbf16>, vector<2x1xf32> -> vector<2x1xf32>
    %c0_75 = arith.constant 0 : index
    %c0_76 = arith.constant 0 : index
    %387 = vector.load %arg12[%c0_75, %c0_76] : memref<1x1xf32, #tpu.memory_space<vmem>>, vector<1x1xf32>
    %388 = vector.broadcast %387 : vector<1x1xf32> to vector<2x1xf32>
    %389 = arith.addf %386, %388 : vector<2x1xf32>
    %c0_77 = arith.constant 0 : index
    %c0_78 = arith.constant 0 : index
    %390 = vector.load %arg13[%c0_77, %c0_78] : memref<2x1xf32, #tpu.memory_space<vmem>>, vector<2x1xf32>
    tpu.vector_store %arg13[%c0_77, %c0_78], %389 {strides = array<i32>} : memref<2x1xf32, #tpu.memory_space<vmem>>, vector<2x1xf32>,
    return
  }
}

</mosaic_0001>

<bundles_post_ra>
// kernel: tpu_custom_call.1
= control target key start
LH: loop header
LB: loop body
LE: loop exit
PB: predicated region body
PF: predicated region fallthrough
CT: control target
= control target key end

     0   :  { %s2998_s0 = inlined_call_operand.hbm [shape: bf16[16,15], index: 0, kind: input, shape index: {}]   ;;  %s2999_s1 = inlined_call_operand.hbm [shape: bf16[15,128], index: 1, kind: input, shape index: {}]   ;;  %s3000_s2 = inlined_call_operand.hbm [shape: f32[1,128], index: 2, kind: input, shape index: {}]   ;;  %s3001_s3 = inlined_call_operand.vmem [shape: bf16[32,128], index: 3, kind: input, shape index: {}]   ;;  %s3002_s4 = inlined_call_operand.vmem [shape: bf16[32,128], index: 4, kind: input, shape index: {}]   ;;  %s3003_s5 = inlined_call_operand.vmem [shape: bf16[32,128], index: 5, kind: input, shape index: {}]   ;;  %s3004_s6 = inlined_call_operand.vmem [shape: f32[1,128], index: 6, kind: input, shape index: {}]   ;;  %s3005_s7 = inlined_call_operand.vmem [shape: f32[1,32], index: 7, kind: input, shape index: {}]   ;;  %s3006_s8 = inlined_call_operand.vmem [shape: f32[1,32], index: 8, kind: input, shape index: {}]   ;;  %s3007_s9 = inlined_call_operand.vmem [shape: bf16[32,16], index: 9, kind: input, shape index: {}]   ;;  %s3008_s10 = inlined_call_operand.vmem [shape: f32[1,16], index: 10, kind: input, shape index: {}]   ;;  %s3009_s11 = inlined_call_operand.vmem [shape: bf16[16,1], index: 11, kind: input, shape index: {}]   ;;  %s3010_s12 = inlined_call_operand.<no memory space> [shape: f32[1,1], index: 12, kind: input, shape index: {}]   ;;  %s3011_s13 = inlined_call_operand.vmem [shape: f32[2,1], index: 13, kind: output, shape index: {}]  }
   0x1   :  { %v18_v0 = vstv %s3010_s12 }
   0x2   :  { %19 = vst [vmem:[#allocation2] sm:$0x1] %v18_v0 }
   0x3   :  { %20 = vsyncpa [#allocation4], 0 }
   0x4   :  { %21 = vsyncpa [#allocation6], 0  ;;  %s2485_s27 = smov [#allocation5]   ;;  %s2486_s29 = smov [#allocation3]  }
   0x5   :  { %s39_s28 = sshll.u32 %s2485_s27, 4  ;;  %s27_s30 = sshll.u32 %s2486_s29, 4  ;;  %s40_s28 = int_to_ptr.vmem [resolvable:$true] %s39_s28  ;;  %s2568_s30 = int_to_ptr.vmem [resolvable:$true] %s27_s30 }
   0x6   :  { %s2415_s16 = scalar_lea.hbm %s2999_s1, 128 }
   0x7   :  { %p2416_p0 = scmp.ne.s32.totalorder %s2999_s1, %s2415_s16  ;;  %p2419_p1 = scmp.lt.u32.totalorder %s2415_s16, %s2999_s1 }
   0x9   :  { %p2421_p2 = pnand %p2419_p1, %p2416_p0 }
   0xb   :  { %2424 = shalt.err (!%p2421_p2)
}
   0xc   :  { %s2425_s20 = scalar_lea.vmem %s40_s28, 128  ;;  %p2430_p4 = scmp.lt.s32.totalorder %s40_s28, %s40_s28 }
   0xd   :  { %p2426_p3 = scmp.ne.s32.totalorder %s40_s28, %s2425_s20  ;;  %p2431_p5 = scmp.lt.s32.totalorder %s2425_s20, %s2425_s20 }
   0xf   :  { %p2432_p6 = por %p2431_p5, %p2430_p4 }
  0x11   :  { %p2433_p7 = pnand %p2432_p6, %p2426_p3 }
  0x13   :  { %2436 = shalt.err (!%p2433_p7)
}
  0x14   :  { %s2487_s21 = smov 64   ;;  %s2488_s22 = smov 4  }
  0x15   :  { %45 = dma.hbm_to_vmem [thread:$0]  %s2999_s1, 128, %s40_s28, [#allocation6], %s2487_s21, %s2487_s21, %s2488_s22  }
  0x16   :  { %s2437_s27 = scalar_lea.hbm %s2998_s0, 128 }
  0x17   :  { %p2438_p8 = scmp.ne.s32.totalorder %s2998_s0, %s2437_s27  ;;  %p2441_p9 = scmp.lt.u32.totalorder %s2437_s27, %s2998_s0 }
  0x19   :  { %p2443_p10 = pnand %p2441_p9, %p2438_p8 }
  0x1b   :  { %2446 = shalt.err (!%p2443_p10)
}
  0x1c   :  { %s2447_s17 = scalar_lea.vmem %s2568_s30, 128  ;;  %p2452_p12 = scmp.lt.s32.totalorder %s2568_s30, %s2568_s30 }
  0x1d   :  { %p2448_p11 = scmp.ne.s32.totalorder %s2568_s30, %s2447_s17  ;;  %p2453_p13 = scmp.lt.s32.totalorder %s2447_s17, %s2447_s17 }
  0x1f   :  { %p2454_p0 = por %p2453_p13, %p2452_p12 }
  0x21   :  { %p2455_p1 = pnand %p2454_p0, %p2448_p11 }
  0x23   :  { %2458 = shalt.err (!%p2455_p1)
}
  0x24   :  { %33 = dma.hbm_to_vmem [thread:$0]  %s2998_s0, 128, %s2568_s30, [#allocation4], %s2487_s21, %s2487_s21, %s2488_s22  }
  0x25   :  { %s2489_s18 = smov [#allocation7]   ;;  %s2459_s23 = scalar_lea.hbm %s3000_s2, 16 }
  0x26   :  { %s52_s19 = sshll.u32 %s2489_s18, 4  ;;  %p2460_p2 = scmp.ne.s32.totalorder %s3000_s2, %s2459_s23  ;;  %s53_s19 = int_to_ptr.vmem [resolvable:$true] %s52_s19 }
  0x27   :  { %p2463_p3 = scmp.lt.u32.totalorder %s2459_s23, %s3000_s2 }
  0x29   :  { %p2465_p4 = pnand %p2463_p3, %p2460_p2 }
  0x2b   :  { %2468 = shalt.err (!%p2465_p4)
}
  0x2c   :  { %s2469_s29 = scalar_lea.vmem %s53_s19, 16  ;;  %s2473_s0 = scalar_lea.vmem %s53_s19, 32 }
  0x2d   :  { %p2470_p5 = scmp.ne.s32.totalorder %s53_s19, %s2469_s29  ;;  %p2474_p6 = scmp.lt.s32.totalorder %s53_s19, %s53_s19 }
  0x2e   :  { %p2475_p7 = scmp.lt.s32.totalorder %s2473_s0, %s2469_s29 }
  0x30   :  { %p2476_p8 = por %p2475_p7, %p2474_p6 }
  0x32   :  { %p2477_p9 = pnand %p2476_p8, %p2470_p5 }
  0x34   :  { %2480 = shalt.err (!%p2477_p9)
}
  0x35   :  { %55 = dma.hbm_to_vmem [thread:$0]  %s3000_s2, 16, %s53_s19, [#allocation6]  }
  0x36   :  { %2481 = dma.done.wait [#allocation4], 128  }
  0x37   :  { %2482 = vsyncadd [#allocation4], 4294967168 }
  0x38   :  { %2483 = dma.done.wait [#allocation6], 144  }
  0x39   :  { %2484 = vsyncadd [#allocation6], 4294967152  ;;  %vm111_vm0 = vcmask 1046528   ;;  %v2490_v1 = vmov 0.0   ;;  %vm2491_vm1 = vmmov 0   ;;  %vm112_vm2 = vcmask 1047552  }
  0x3a   :  { %2047 = vmatprep.subr.bf16.mxu0 %v2490_v1  ;;  %2053 = vmatprep.subr.bf16.mxu1 %v2490_v1  ;;  %v2492_v2 = vmov 65535   ;;  %v2269_v5 = vld [vmem:[#allocation5] sm:$0xff]   ;;  %v2270_v7 = vld [vmem:[#allocation3] sm:$0xff]   ;;  %vm107_vm3 = vcmask 121856   ;;  %v2493_v10 = vmov 0   ;;  %s2494_s17 = smov 32  }
  0x3b   :  { %2049 = vmatprep.mubr.msk.bf16.mxu0 %vm2491_vm1, %v2490_v1  ;;  %2057 = vmatprep.mubr.msk.bf16.mxu1 %vm2491_vm1, %v2490_v1  ;;  %v113_v3 = vsel %vm111_vm0, 4294967295, %v2492_v2  ;;  %v2624_v8 = vld [vmem:[%s3001_s3] sm:$0xff]   ;;  %v2630_v9 = vld [vmem:[%s3001_s3 + $0x8] sm:$0xff]   ;;  %v1910_v13 = vld [vmem:[#allocation7] ss:$0 sm:$0xff]  ;;  %vm190_vm4 = vcmask 261120  }
  0x3c   :  { %v114_v4 = vsel %vm112_vm2, %v113_v3, 0  ;;  %v2653_v33 = vld [vmem:[%s3003_s5] sm:$0xff]   ;;  %v2659_v34 = vld [vmem:[%s3003_s5 + $0x8] sm:$0xff]   ;;  %vm1732_vm5 = vcmask 254976   ;;  %vm1858_vm6 = vcmask 130048   ;;  %vm1902_vm7 = vcmask 1024  }
  0x3d   :  { %v116_v6 = vand.u32 %v2269_v5, %v114_v4  ;;  %2054 = vmatpush3.bf16.msra.mxu1 %v2653_v33  ;;  %v2668_v35 = vld [vmem:[%s3002_s4] sm:$0xff]   ;;  %v2678_v37 = vld [vmem:[%s3002_s4 + $0x8] sm:$0xff]  }
  0x3e   :  { %2055 = vmatprep.subr.bf16.mxu1 %v2490_v1  ;;  %v2703_v46 = vld [vmem:[%s3004_s6] ss:$0 sm:$0xff] }
  0x3f   :  { %2048 = vmatpush3.bf16.msra.mxu0 %v116_v6 }
  0x40   :  { %2061 = vmatprep.subr.bf16.mxu0 %v2490_v1 }
  0x41   :  { %2056 = vmatpush3.bf16.msra.mxu1 %v2659_v34 }
  0x42   :  { %2050 = vmatmul.mubr.msk.bf16.vlgmr.msra.gmra.mrb[0].mxu0 %vm107_vm3, %v2270_v7  ;;  %2069 = vmatprep.subr.bf16.mxu1 %v2490_v1 }
  0x43   :  { %2062 = vmatpush3.bf16.msra.mxu0 %v2624_v8  ;;  %2065 = vmatprep.mubr.msk.bf16.mxu0 %vm2491_vm1, %v2490_v1 }
  0x44   :  { %2063 = vmatprep.subr.bf16.mxu0 %v2490_v1  ;;  %2058 = vmatmul.mubr.bf16.vlgmr.msra.gmra.mrb[0].mxu1 %v2493_v10 }
  0x45   :  { %2070 = vmatpush3.bf16.msra.mxu1 %v2668_v35  ;;  %2073 = vmatprep.mubr.msk.bf16.mxu1 %vm2491_vm1, %v2490_v1 }
  0x46   :  { %2071 = vmatprep.subr.bf16.mxu1 %v2490_v1 }
  0x47   :  { %2064 = vmatpush3.bf16.msra.mxu0 %v2630_v9 }
  0x48   :  { %2077 = vmatprep.subr.bf16.mxu0 %v2490_v1 }
  0x49   :  { %2072 = vmatpush3.bf16.msra.mxu1 %v2678_v37 }
  0x4a   :  { %2066 = vmatmul.mubr.bf16.vlgmr.msra.gmra.mrb[4].mxu0 %v2493_v10  ;;  %2085 = vmatprep.subr.bf16.mxu1 %v2490_v1 }
  0x4b   :  { %2081 = vmatprep.mubr.msk.bf16.mxu0 %vm2491_vm1, %v2490_v1  ;;  %2078 = vmatpush3.bf16.msra.mxu0 %v2653_v33 }
  0x4c   :  { %2079 = vmatprep.subr.bf16.mxu0 %v2490_v1 }
  0x4f   :  { %2080 = vmatpush3.bf16.msra.mxu0 %v2659_v34 }
  0x50   :  { %2093 = vmatprep.subr.bf16.mxu0 %v2490_v1 }
 0x115   :  { %v152_v11 = vpop.f32.mrb[0].mxu0 }
 0x116   :  { %v2051_v12 = vpop.f32.mrb[1].mxu0  ;;  %v2642_v17 = vadd.f32 %v1910_v13, %v152_v11 }
 0x117   :  { %v155_v14 = vpop.f32.mrb[2].mxu0  ;;  %v228_v41 = vpop.f32.mrb[0].mxu1 }
 0x118   :  { %v2640_v15 = vadd.f32 %v1910_v13, %v155_v14  ;;  %v2052_v16 = vpop.f32.mrb[3].mxu0  ;;  %v2059_v42 = vpop.f32.mrb[1].mxu1 }
 0x119   :  { %v231_v43 = vpop.f32.mrb[2].mxu1 }
 0x11a   :  { %v2060_v44 = vpop.f32.mrb[3].mxu1 }
 0x11d   :  { %v280_v18 = vpop.f32.mrb[4].mxu0 }
 0x11e   :  { %v286_v19 = vadd.f32 %v280_v18, %v2642_v17  ;;  %v2067_v20 = vpop.f32.mrb[5].mxu0 }
 0x11f   :  { %v283_v21 = vpop.f32.mrb[6].mxu0 }
 0x120   :  { %2280 = vtanh.f32 %v286_v19  ;;  %v2068_v22 = vpop.f32.mrb[7].mxu0  ;;  %v1919_v24 = vmul.f32 -1.442695, %v286_v19 }
 0x122   :  { %2282 = vpow2.f32 %v1919_v24 }
 0x12a   :  { %v2281_v23 = vpop.eup %2280 }
 0x12b   :  { %296 = vrot.lane.b32.xlu0 %v2281_v23, %s2494_s17 }
 0x12c   :  { %v2283_v25 = vpop.eup %2282 }
 0x12d   :  { %v290_v26 = vadd.f32 1.0, %v2283_v25 }
 0x12f   :  { %2284 = vrcp.f32 %v290_v26 }
 0x139   :  { %v2285_v27 = vpop.eup %2284 }
 0x13a   :  { %v294_v30 = vmul.f32 0.0, %v2285_v27 }
 0x19d   :  { %v297_v28 = vpop.permute.xlu0 %296 }
 0x19e   :  { %v299_v29 = vmul.f32 %v2285_v27, %v297_v28 }
 0x1a0   :  { %301 = vrot.lane.b32.xlu0 %v299_v29, %s2494_s17 }
 0x212   :  { %v302_v31 = vpop.permute.xlu0 %301 }
 0x213   :  { %v2647_v32 = vadd.f32 %v302_v31, %v294_v30 }
 0x215   :  { %2286 = vtanh.f32 %v2647_v32  ;;  %v494_v16 = vrot.slane %v2647_v32, 6 }
 0x21f   :  { %v2287_v36 = vpop.eup %2286 }
 0x220   :  { %307 = vrot.lane.b32.xlu1 %v2287_v36, %s2494_s17 }
 0x292   :  { %v308_v38 = vpop.permute.xlu1 %307 }
 0x293   :  { %v310_v39 = vmul.f32 %v2285_v27, %v308_v38 }
 0x295   :  { %v311_v40 = vpack.c.bf16 %v310_v39, %v310_v39 }
 0x297   :  { %313 = vrot.lane.b32.xlu1 %v311_v40, %s2487_s21 }
 0x309   :  { %v314_v45 = vpop.permute.xlu1 %313 }
 0x30a   :  { %2074 = vmatmul.mubr.msk.bf16.vlgmr.msra.gmra.mrb[4].mxu1 %vm190_vm4, %v314_v45 }
 0x30b   :  { %2086 = vmatpush3.bf16.msra.mxu1 %v2624_v8  ;;  %2089 = vmatprep.mubr.msk.bf16.mxu1 %vm2491_vm1, %v2490_v1 }
 0x30c   :  { %2087 = vmatprep.subr.bf16.mxu1 %v2490_v1 }
 0x30f   :  { %2088 = vmatpush3.bf16.msra.mxu1 %v2630_v9 }
 0x310   :  { %2101 = vmatprep.subr.bf16.mxu1 %v2490_v1 }
 0x312   :  { %2090 = vmatmul.mubr.msk.bf16.vlgmr.msra.gmra.mrb[8].mxu1 %vm190_vm4, %v314_v45 }
 0x313   :  { %2102 = vmatpush3.bf16.msra.mxu1 %v2653_v33  ;;  %2105 = vmatprep.mubr.msk.bf16.mxu1 %vm2491_vm1, %v2490_v1 }
 0x314   :  { %2103 = vmatprep.subr.bf16.mxu1 %v2490_v1 }
 0x317   :  { %2104 = vmatpush3.bf16.msra.mxu1 %v2659_v34 }
 0x318   :  { %2117 = vmatprep.subr.bf16.mxu1 %v2490_v1 }
 0x3dd   :  { %v364_v47 = vpop.f32.mrb[4].mxu1 }
 0x3de   :  { %v365_v48 = vadd.f32 %v364_v47, %v228_v41  ;;  %v2075_v49 = vpop.f32.mrb[5].mxu1 }
 0x3df   :  { %v367_v50 = vpop.f32.mrb[6].mxu1 }
 0x3e0   :  { %v370_v51 = vadd.f32 %v2703_v46, %v365_v48  ;;  %v2076_v52 = vpop.f32.mrb[7].mxu1 }
 0x3e2   :  { %2288 = vtanh.f32 %v370_v51  ;;  %v1923_v61 = vmul.f32 -1.442695, %v370_v51 }
 0x3e5   :  { %v476_v53 = vpop.f32.mrb[8].mxu1 }
 0x3e6   :  { %v483_v54 = vrot.slane %v476_v53, 6  ;;  %v2091_v55 = vpop.f32.mrb[9].mxu1 }
 0x3e7   :  { %v479_v56 = vpop.f32.mrb[10].mxu1 }
 0x3e8   :  { %v485_v57 = vadd.f32 %v483_v54, %v2642_v17  ;;  %v2092_v58 = vpop.f32.mrb[11].mxu1 }
 0x3ea   :  { %2290 = vtanh.f32 %v485_v57  ;;  %v1926_v62 = vmul.f32 -1.442695, %v485_v57 }
 0x3eb   :  { %2292 = vpow2.f32 %v1923_v61 }
 0x3ec   :  { %v2289_v59 = vpop.eup %2288  ;;  %2294 = vpow2.f32 %v1926_v62 }
 0x3ed   :  { %380 = vrot.lane.b32.xlu0 %v2289_v59, %s2494_s17 }
 0x3f4   :  { %v2291_v60 = vpop.eup %2290 }
 0x3f5   :  { %498 = vrot.lane.b32.xlu1 %v2291_v60, %s2494_s17  ;;  %v2293_v63 = vpop.eup %2292 }
 0x3f6   :  { %v374_v0 = vadd.f32 1.0, %v2293_v63  ;;  %v2295_v2 = vpop.eup %2294 }
 0x3f7   :  { %v489_v3 = vadd.f32 1.0, %v2295_v2 }
 0x3f8   :  { %2296 = vrcp.f32 %v374_v0 }
 0x3f9   :  { %2298 = vrcp.f32 %v489_v3 }
 0x402   :  { %v2297_v4 = vpop.eup %2296 }
 0x403   :  { %v2299_v7 = vpop.eup %2298  ;;  %v378_v12 = vmul.f32 0.0, %v2297_v4 }
 0x404   :  { %v496_v18 = vmul.f32 %v2299_v7, %v494_v16 }
 0x45f   :  { %v381_v5 = vpop.permute.xlu0 %380 }
 0x460   :  { %v383_v6 = vmul.f32 %v2297_v4, %v381_v5 }
 0x462   :  { %385 = vrot.lane.b32.xlu0 %v383_v6, %s2494_s17 }
 0x467   :  { %v499_v10 = vpop.permute.xlu1 %498 }
 0x468   :  { %v501_v11 = vmul.f32 %v2299_v7, %v499_v10 }
 0x46a   :  { %503 = vrot.lane.b32.xlu1 %v501_v11, %s2494_s17 }
 0x4d4   :  { %v386_v13 = vpop.permute.xlu0 %385 }
 0x4d5   :  { %v2711_v14 = vadd.f32 %v386_v13, %v378_v12 }
 0x4d7   :  { %2300 = vtanh.f32 %v2711_v14 }
 0x4dc   :  { %v504_v19 = vpop.permute.xlu1 %503 }
 0x4dd   :  { %v2715_v20 = vadd.f32 %v504_v19, %v496_v18 }
 0x4df   :  { %2302 = vtanh.f32 %v2715_v20 }
 0x4e1   :  { %v2301_v21 = vpop.eup %2300 }
 0x4e2   :  { %391 = vrot.lane.b32.xlu0 %v2301_v21, %s2494_s17 }
 0x4e9   :  { %v2303_v22 = vpop.eup %2302 }
 0x4ea   :  { %509 = vrot.lane.b32.xlu1 %v2303_v22, %s2494_s17 }
 0x554   :  { %v392_v23 = vpop.permute.xlu0 %391 }
 0x555   :  { %v394_v24 = vmul.f32 %v2297_v4, %v392_v23 }
 0x557   :  { %v395_v25 = vpack.c.bf16 %v394_v24, %v394_v24 }
 0x559   :  { %397 = vrot.lane.b32.xlu0 %v395_v25, %s2487_s21 }
 0x55c   :  { %v510_v26 = vpop.permute.xlu1 %509 }
 0x55d   :  { %v512_v27 = vmul.f32 %v2299_v7, %v510_v26  ;;  %v685_v7 = vrot.slane %v2715_v20, 6 }
 0x55f   :  { %v513_v28 = vpack.c.bf16 %v512_v27, %v512_v27 }
 0x561   :  { %v515_v29 = vrot.slane %v513_v28, 1 }
 0x563   :  { %516 = vrot.lane.b32.xlu1 %v515_v29, %s2487_s21 }
 0x5cb   :  { %v398_v30 = vpop.permute.xlu0 %397 }
 0x5cc   :  { %2082 = vmatmul.mubr.msk.bf16.vlgmr.msra.gmra.mrb[8].mxu0 %vm190_vm4, %v398_v30 }
 0x5cd   :  { %2094 = vmatpush3.bf16.msra.mxu0 %v2668_v35  ;;  %2097 = vmatprep.mubr.msk.bf16.mxu0 %vm2491_vm1, %v2490_v1 }
 0x5ce   :  { %2095 = vmatprep.subr.bf16.mxu0 %v2490_v1 }
 0x5d1   :  { %2096 = vmatpush3.bf16.msra.mxu0 %v2678_v37 }
 0x5d2   :  { %2109 = vmatprep.subr.bf16.mxu0 %v2490_v1 }
 0x5d5   :  { %v517_v31 = vpop.permute.xlu1 %516 }
 0x5d6   :  { %2098 = vmatmul.mubr.msk.bf16.vlgmr.msra.gmra.mrb[12].mxu0 %vm190_vm4, %v517_v31 }
 0x5d7   :  { %2110 = vmatpush3.bf16.msra.mxu0 %v2624_v8  ;;  %2113 = vmatprep.mubr.msk.bf16.mxu0 %vm2491_vm1, %v2490_v1 }
 0x5d8   :  { %2111 = vmatprep.subr.bf16.mxu0 %v2490_v1 }
 0x5db   :  { %2112 = vmatpush3.bf16.msra.mxu0 %v2630_v9 }
 0x5dc   :  { %2125 = vmatprep.subr.bf16.mxu0 %v2490_v1 }
 0x5de   :  { %2114 = vmatmul.mubr.msk.bf16.vlgmr.msra.gmra.mrb[16].mxu0 %vm190_vm4, %v517_v31 }
 0x5df   :  { %2126 = vmatpush3.bf16.msra.mxu0 %v2653_v33  ;;  %2129 = vmatprep.mubr.msk.bf16.mxu0 %vm2491_vm1, %v2490_v1 }
 0x5e0   :  { %2127 = vmatprep.subr.bf16.mxu0 %v2490_v1 }
 0x5e3   :  { %2128 = vmatpush3.bf16.msra.mxu0 %v2659_v34 }
 0x5e4   :  { %2141 = vmatprep.subr.bf16.mxu0 %v2490_v1 }
 0x69f   :  { %v436_v32 = vpop.f32.mrb[8].mxu0 }
 0x6a0   :  { %v2083_v36 = vpop.f32.mrb[9].mxu0 }
 0x6a1   :  { %v439_v38 = vpop.f32.mrb[10].mxu0 }
 0x6a2   :  { %v2084_v39 = vpop.f32.mrb[11].mxu0 }
 0x6a9   :  { %v555_v40 = vpop.f32.mrb[12].mxu0 }
 0x6aa   :  { %v556_v41 = vadd.f32 %v555_v40, %v436_v32  ;;  %v2099_v42 = vpop.f32.mrb[13].mxu0 }
 0x6ab   :  { %v558_v43 = vpop.f32.mrb[14].mxu0 }
 0x6ac   :  { %v561_v44 = vadd.f32 %v2703_v46, %v556_v41  ;;  %v2100_v45 = vpop.f32.mrb[15].mxu0 }
 0x6ae   :  { %2304 = vtanh.f32 %v561_v44  ;;  %v1928_v55 = vmul.f32 -1.442695, %v561_v44 }
 0x6b1   :  { %v667_v47 = vpop.f32.mrb[16].mxu0 }
 0x6b2   :  { %v674_v48 = vrot.slane %v667_v47, 4  ;;  %v2115_v49 = vpop.f32.mrb[17].mxu0 }
 0x6b3   :  { %v670_v50 = vpop.f32.mrb[18].mxu0 }
 0x6b4   :  { %v676_v51 = vadd.f32 %v674_v48, %v2642_v17  ;;  %v2116_v52 = vpop.f32.mrb[19].mxu0 }
 0x6b6   :  { %2306 = vtanh.f32 %v676_v51  ;;  %v1931_v56 = vmul.f32 -1.442695, %v676_v51 }
 0x6b7   :  { %2308 = vpow2.f32 %v1928_v55 }
 0x6b8   :  { %v2305_v53 = vpop.eup %2304  ;;  %2310 = vpow2.f32 %v1931_v56 }
 0x6b9   :  { %571 = vrot.lane.b32.xlu0 %v2305_v53, %s2494_s17 }
 0x6c0   :  { %v2307_v54 = vpop.eup %2306 }
 0x6c1   :  { %689 = vrot.lane.b32.xlu1 %v2307_v54, %s2494_s17  ;;  %v2309_v57 = vpop.eup %2308 }
 0x6c2   :  { %v565_v58 = vadd.f32 1.0, %v2309_v57  ;;  %v2311_v59 = vpop.eup %2310 }
 0x6c3   :  { %v680_v60 = vadd.f32 1.0, %v2311_v59 }
 0x6c4   :  { %2312 = vrcp.f32 %v565_v58 }
 0x6c5   :  { %2314 = vrcp.f32 %v680_v60 }
 0x6ce   :  { %v2313_v61 = vpop.eup %2312 }
 0x6cf   :  { %v2315_v0 = vpop.eup %2314  ;;  %v569_v4 = vmul.f32 %v2313_v61, %v2711_v14 }
 0x6d0   :  { %v687_v10 = vmul.f32 %v2315_v0, %v685_v7 }
 0x72b   :  { %v572_v62 = vpop.permute.xlu0 %571 }
 0x72c   :  { %v574_v63 = vmul.f32 %v2313_v61, %v572_v62 }
 0x72e   :  { %576 = vrot.lane.b32.xlu0 %v574_v63, %s2494_s17 }
 0x733   :  { %v690_v2 = vpop.permute.xlu1 %689 }
 0x734   :  { %v692_v3 = vmul.f32 %v2315_v0, %v690_v2 }
 0x736   :  { %694 = vrot.lane.b32.xlu1 %v692_v3, %s2494_s17 }
 0x7a0   :  { %v577_v5 = vpop.permute.xlu0 %576 }
 0x7a1   :  { %v2750_v6 = vadd.f32 %v577_v5, %v569_v4 }
 0x7a3   :  { %2316 = vtanh.f32 %v2750_v6 }
 0x7a8   :  { %v695_v11 = vpop.permute.xlu1 %694 }
 0x7a9   :  { %v2754_v12 = vadd.f32 %v695_v11, %v687_v10 }
 0x7ab   :  { %2318 = vtanh.f32 %v2754_v12  ;;  %v876_v63 = vrot.slane %v2754_v12, 6 }
 0x7ad   :  { %v2317_v13 = vpop.eup %2316 }
 0x7ae   :  { %582 = vrot.lane.b32.xlu0 %v2317_v13, %s2494_s17 }
 0x7b5   :  { %v2319_v16 = vpop.eup %2318 }
 0x7b6   :  { %700 = vrot.lane.b32.xlu1 %v2319_v16, %s2494_s17 }
 0x820   :  { %v583_v14 = vpop.permute.xlu0 %582 }
 0x821   :  { %v585_v18 = vmul.f32 %v2313_v61, %v583_v14 }
 0x823   :  { %v586_v19 = vpack.c.bf16 %v585_v18, %v585_v18 }
 0x825   :  { %588 = vrot.lane.b32.xlu0 %v586_v19, %s2487_s21 }
 0x828   :  { %v701_v21 = vpop.permute.xlu1 %700 }
 0x829   :  { %v703_v22 = vmul.f32 %v2315_v0, %v701_v21 }
 0x82b   :  { %v704_v20 = vpack.c.bf16 %v703_v22, %v703_v22 }
 0x82d   :  { %v706_v23 = vrot.slane %v704_v20, 2 }
 0x82f   :  { %707 = vrot.lane.b32.xlu1 %v706_v23, %s2487_s21 }
 0x897   :  { %v589_v24 = vpop.permute.xlu0 %588 }
 0x898   :  { %2106 = vmatmul.mubr.msk.bf16.vlgmr.msra.gmra.mrb[12].mxu1 %vm190_vm4, %v589_v24 }
 0x899   :  { %2118 = vmatpush3.bf16.msra.mxu1 %v2668_v35  ;;  %2121 = vmatprep.mubr.msk.bf16.mxu1 %vm2491_vm1, %v2490_v1 }
 0x89a   :  { %2119 = vmatprep.subr.bf16.mxu1 %v2490_v1 }
 0x89d   :  { %2120 = vmatpush3.bf16.msra.mxu1 %v2678_v37 }
 0x89e   :  { %2133 = vmatprep.subr.bf16.mxu1 %v2490_v1 }
 0x8a1   :  { %v708_v25 = vpop.permute.xlu1 %707 }
 0x8a2   :  { %2122 = vmatmul.mubr.msk.bf16.vlgmr.msra.gmra.mrb[16].mxu1 %vm190_vm4, %v708_v25 }
 0x8a3   :  { %2134 = vmatpush3.bf16.msra.mxu1 %v2624_v8  ;;  %2137 = vmatprep.mubr.msk.bf16.mxu1 %vm2491_vm1, %v2490_v1 }
 0x8a4   :  { %2135 = vmatprep.subr.bf16.mxu1 %v2490_v1 }
 0x8a7   :  { %2136 = vmatpush3.bf16.msra.mxu1 %v2630_v9 }
 0x8a8   :  { %2149 = vmatprep.subr.bf16.mxu1 %v2490_v1 }
 0x8aa   :  { %2138 = vmatmul.mubr.msk.bf16.vlgmr.msra.gmra.mrb[20].mxu1 %vm190_vm4, %v708_v25 }
 0x8ab   :  { %2150 = vmatpush3.bf16.msra.mxu1 %v2653_v33  ;;  %2153 = vmatprep.mubr.msk.bf16.mxu1 %vm2491_vm1, %v2490_v1 }
 0x8ac   :  { %2151 = vmatprep.subr.bf16.mxu1 %v2490_v1 }
 0x8af   :  { %2152 = vmatpush3.bf16.msra.mxu1 %v2659_v34 }
 0x8b0   :  { %2165 = vmatprep.subr.bf16.mxu1 %v2490_v1 }
 0x96b   :  { %v627_v26 = vpop.f32.mrb[12].mxu1 }
 0x96c   :  { %v2107_v27 = vpop.f32.mrb[13].mxu1 }
 0x96d   :  { %v630_v28 = vpop.f32.mrb[14].mxu1 }
 0x96e   :  { %v2108_v29 = vpop.f32.mrb[15].mxu1 }
 0x975   :  { %v746_v30 = vpop.f32.mrb[16].mxu1 }
 0x976   :  { %v747_v31 = vadd.f32 %v746_v30, %v627_v26  ;;  %v2123_v32 = vpop.f32.mrb[17].mxu1 }
 0x977   :  { %v749_v36 = vpop.f32.mrb[18].mxu1 }
 0x978   :  { %v752_v38 = vadd.f32 %v2703_v46, %v747_v31  ;;  %v2124_v39 = vpop.f32.mrb[19].mxu1 }
 0x97a   :  { %2320 = vtanh.f32 %v752_v38  ;;  %v1933_v49 = vmul.f32 -1.442695, %v752_v38 }
 0x97d   :  { %v858_v40 = vpop.f32.mrb[20].mxu1 }
 0x97e   :  { %v865_v41 = vrot.slane %v858_v40, 2  ;;  %v2139_v42 = vpop.f32.mrb[21].mxu1 }
 0x97f   :  { %v861_v43 = vpop.f32.mrb[22].mxu1 }
 0x980   :  { %v867_v44 = vadd.f32 %v865_v41, %v2642_v17  ;;  %v2140_v45 = vpop.f32.mrb[23].mxu1 }
 0x982   :  { %2322 = vtanh.f32 %v867_v44  ;;  %v1936_v50 = vmul.f32 -1.442695, %v867_v44 }
 0x983   :  { %2324 = vpow2.f32 %v1933_v49 }
 0x984   :  { %v2321_v47 = vpop.eup %2320  ;;  %2326 = vpow2.f32 %v1936_v50 }
 0x985   :  { %762 = vrot.lane.b32.xlu0 %v2321_v47, %s2494_s17 }
 0x98c   :  { %v2323_v48 = vpop.eup %2322 }
 0x98d   :  { %880 = vrot.lane.b32.xlu1 %v2323_v48, %s2494_s17  ;;  %v2325_v51 = vpop.eup %2324 }
 0x98e   :  { %v756_v52 = vadd.f32 1.0, %v2325_v51  ;;  %v2327_v53 = vpop.eup %2326 }
 0x98f   :  { %v871_v54 = vadd.f32 1.0, %v2327_v53 }
 0x990   :  { %2328 = vrcp.f32 %v756_v52 }
 0x991   :  { %2330 = vrcp.f32 %v871_v54 }
 0x99a   :  { %v2329_v55 = vpop.eup %2328 }
 0x99b   :  { %v2331_v57 = vpop.eup %2330  ;;  %v760_v60 = vmul.f32 %v2329_v55, %v2750_v6 }
 0x99c   :  { %v878_v0 = vmul.f32 %v2331_v57, %v876_v63 }
 0x9f7   :  { %v763_v17 = vpop.permute.xlu0 %762 }
 0x9f8   :  { %v765_v56 = vmul.f32 %v2329_v55, %v763_v17 }
 0x9fa   :  { %767 = vrot.lane.b32.xlu0 %v765_v56, %s2494_s17 }
 0x9ff   :  { %v881_v58 = vpop.permute.xlu1 %880 }
 0xa00   :  { %v883_v59 = vmul.f32 %v2331_v57, %v881_v58 }
 0xa02   :  { %885 = vrot.lane.b32.xlu1 %v883_v59, %s2494_s17 }
 0xa6c   :  { %v768_v61 = vpop.permute.xlu0 %767 }
 0xa6d   :  { %v2789_v62 = vadd.f32 %v768_v61, %v760_v60 }
 0xa6f   :  { %2332 = vtanh.f32 %v2789_v62 }
 0xa74   :  { %v886_v2 = vpop.permute.xlu1 %885 }
 0xa75   :  { %v2793_v3 = vadd.f32 %v886_v2, %v878_v0 }
 0xa77   :  { %2334 = vtanh.f32 %v2793_v3  ;;  %v1064_v17 = vrot.slane %v2793_v3, 6 }
 0xa79   :  { %v2333_v4 = vpop.eup %2332 }
 0xa7a   :  { %773 = vrot.lane.b32.xlu0 %v2333_v4, %s2494_s17 }
 0xa81   :  { %v2335_v5 = vpop.eup %2334 }
 0xa82   :  { %891 = vrot.lane.b32.xlu1 %v2335_v5, %s2494_s17 }
 0xaec   :  { %v774_v6 = vpop.permute.xlu0 %773 }
 0xaed   :  { %v776_v7 = vmul.f32 %v2329_v55, %v774_v6 }
 0xaef   :  { %v777_v10 = vpack.c.bf16 %v776_v7, %v776_v7 }
 0xaf1   :  { %779 = vrot.lane.b32.xlu0 %v777_v10, %s2487_s21 }
 0xaf4   :  { %v892_v11 = vpop.permute.xlu1 %891 }
 0xaf5   :  { %v894_v13 = vmul.f32 %v2331_v57, %v892_v11 }
 0xaf7   :  { %v895_v12 = vpack.c.bf16 %v894_v13, %v894_v13 }
 0xaf9   :  { %v897_v16 = vrot.slane %v895_v12, 3 }
 0xafb   :  { %898 = vrot.lane.b32.xlu1 %v897_v16, %s2487_s21 }
 0xb63   :  { %v780_v14 = vpop.permute.xlu0 %779 }
 0xb64   :  { %2130 = vmatmul.mubr.msk.bf16.vlgmr.msra.gmra.mrb[20].mxu0 %vm190_vm4, %v780_v14 }
 0xb65   :  { %2142 = vmatpush3.bf16.msra.mxu0 %v2668_v35  ;;  %2145 = vmatprep.mubr.msk.bf16.mxu0 %vm2491_vm1, %v2490_v1 }
 0xb66   :  { %2143 = vmatprep.subr.bf16.mxu0 %v2490_v1 }
 0xb69   :  { %2144 = vmatpush3.bf16.msra.mxu0 %v2678_v37 }
 0xb6a   :  { %2157 = vmatprep.subr.bf16.mxu0 %v2490_v1 }
 0xb6d   :  { %v899_v18 = vpop.permute.xlu1 %898 }
 0xb6e   :  { %2146 = vmatmul.mubr.msk.bf16.vlgmr.msra.gmra.mrb[24].mxu0 %vm190_vm4, %v899_v18 }
 0xb6f   :  { %2158 = vmatpush3.bf16.msra.mxu0 %v2624_v8  ;;  %2161 = vmatprep.mubr.msk.bf16.mxu0 %vm2491_vm1, %v2490_v1 }
 0xb70   :  { %2159 = vmatprep.subr.bf16.mxu0 %v2490_v1 }
 0xb73   :  { %2160 = vmatpush3.bf16.msra.mxu0 %v2630_v9 }
 0xb74   :  { %2173 = vmatprep.subr.bf16.mxu0 %v2490_v1 }
 0xb76   :  { %2162 = vmatmul.mubr.msk.bf16.vlgmr.msra.gmra.mrb[28].mxu0 %vm190_vm4, %v899_v18 }
 0xb77   :  { %2174 = vmatpush3.bf16.msra.mxu0 %v2653_v33  ;;  %2177 = vmatprep.mubr.msk.bf16.mxu0 %vm2491_vm1, %v2490_v1 }
 0xb78   :  { %2175 = vmatprep.subr.bf16.mxu0 %v2490_v1 }
 0xb7b   :  { %2176 = vmatpush3.bf16.msra.mxu0 %v2659_v34 }
 0xb7c   :  { %2189 = vmatprep.subr.bf16.mxu0 %v2490_v1 }
 0xc37   :  { %v818_v19 = vpop.f32.mrb[20].mxu0 }
 0xc38   :  { %v2131_v21 = vpop.f32.mrb[21].mxu0 }
 0xc39   :  { %v821_v22 = vpop.f32.mrb[22].mxu0 }
 0xc3a   :  { %v2132_v20 = vpop.f32.mrb[23].mxu0 }
 0xc41   :  { %v937_v23 = vpop.f32.mrb[24].mxu0 }
 0xc42   :  { %v938_v24 = vadd.f32 %v937_v23, %v818_v19  ;;  %v2147_v25 = vpop.f32.mrb[25].mxu0 }
 0xc43   :  { %v940_v26 = vpop.f32.mrb[26].mxu0 }
 0xc44   :  { %v943_v27 = vadd.f32 %v2703_v46, %v938_v24  ;;  %v2148_v28 = vpop.f32.mrb[27].mxu0 }
 0xc46   :  { %2336 = vtanh.f32 %v943_v27  ;;  %v1938_v40 = vmul.f32 -1.442695, %v943_v27 }
 0xc49   :  { %v1049_v29 = vpop.f32.mrb[28].mxu0 }
 0xc4a   :  { %v1055_v30 = vadd.f32 %v1049_v29, %v2640_v15  ;;  %v2163_v31 = vpop.f32.mrb[29].mxu0 }
 0xc4b   :  { %v1052_v32 = vpop.f32.mrb[30].mxu0 }
 0xc4c   :  { %2338 = vtanh.f32 %v1055_v30  ;;  %v2164_v36 = vpop.f32.mrb[31].mxu0  ;;  %v1941_v41 = vmul.f32 -1.442695, %v1055_v30 }
 0xc4d   :  { %2340 = vpow2.f32 %v1938_v40 }
 0xc4e   :  { %2342 = vpow2.f32 %v1941_v41 }
 0xc50   :  { %v2337_v38 = vpop.eup %2336 }
 0xc51   :  { %953 = vrot.lane.b32.xlu0 %v2337_v38, %s2494_s17 }
 0xc56   :  { %v2339_v39 = vpop.eup %2338 }
 0xc57   :  { %1068 = vrot.lane.b32.xlu1 %v2339_v39, %s2494_s17  ;;  %v2341_v42 = vpop.eup %2340 }
 0xc58   :  { %v947_v43 = vadd.f32 1.0, %v2341_v42  ;;  %v2343_v44 = vpop.eup %2342 }
 0xc59   :  { %v1059_v45 = vadd.f32 1.0, %v2343_v44 }
 0xc5a   :  { %2344 = vrcp.f32 %v947_v43 }
 0xc5b   :  { %2346 = vrcp.f32 %v1059_v45 }
 0xc64   :  { %v2345_v47 = vpop.eup %2344 }
 0xc65   :  { %v2347_v50 = vpop.eup %2346  ;;  %v951_v53 = vmul.f32 %v2345_v47, %v2789_v62 }
 0xc66   :  { %v1066_v56 = vmul.f32 %v2347_v50, %v1064_v17 }
 0xcc3   :  { %v954_v48 = vpop.permute.xlu0 %953 }
 0xcc4   :  { %v956_v49 = vmul.f32 %v2345_v47, %v954_v48 }
 0xcc6   :  { %958 = vrot.lane.b32.xlu0 %v956_v49, %s2494_s17 }
 0xcc9   :  { %v1069_v51 = vpop.permute.xlu1 %1068 }
 0xcca   :  { %v1071_v52 = vmul.f32 %v2347_v50, %v1069_v51 }
 0xccc   :  { %1073 = vrot.lane.b32.xlu1 %v1071_v52, %s2494_s17 }
 0xd38   :  { %v959_v54 = vpop.permute.xlu0 %958 }
 0xd39   :  { %v2828_v55 = vadd.f32 %v959_v54, %v951_v53 }
 0xd3b   :  { %2348 = vtanh.f32 %v2828_v55 }
 0xd3e   :  { %v1074_v57 = vpop.permute.xlu1 %1073 }
 0xd3f   :  { %v2832_v58 = vadd.f32 %v1074_v57, %v1066_v56 }
 0xd41   :  { %2350 = vtanh.f32 %v2832_v58  ;;  %v1254_v48 = vrot.slane %v2832_v58, 6 }
 0xd45   :  { %v2349_v59 = vpop.eup %2348 }
 0xd46   :  { %964 = vrot.lane.b32.xlu0 %v2349_v59, %s2494_s17 }
 0xd4b   :  { %v2351_v60 = vpop.eup %2350 }
 0xd4c   :  { %1079 = vrot.lane.b32.xlu1 %v2351_v60, %s2494_s17 }
 0xdb8   :  { %v965_v61 = vpop.permute.xlu0 %964 }
 0xdb9   :  { %v967_v62 = vmul.f32 %v2345_v47, %v965_v61 }
 0xdbb   :  { %v968_v63 = vpack.c.bf16 %v967_v62, %v967_v62 }
 0xdbd   :  { %970 = vrot.lane.b32.xlu0 %v968_v63, %s2487_s21 }
 0xdbe   :  { %v1080_v0 = vpop.permute.xlu1 %1079 }
 0xdbf   :  { %v1082_v2 = vmul.f32 %v2347_v50, %v1080_v0 }
 0xdc1   :  { %v1083_v3 = vpack.c.bf16 %v1082_v2, %v1082_v2 }
 0xdc3   :  { %1085 = vrot.lane.b32.xlu1 %v1083_v3, %s2487_s21 }
 0xe2f   :  { %v971_v4 = vpop.permute.xlu0 %970 }
 0xe30   :  { %2154 = vmatmul.mubr.msk.bf16.vlgmr.msra.gmra.mrb[24].mxu1 %vm190_vm4, %v971_v4 }
 0xe31   :  { %2166 = vmatpush3.bf16.msra.mxu1 %v2668_v35  ;;  %2169 = vmatprep.mubr.msk.bf16.mxu1 %vm2491_vm1, %v2490_v1 }
 0xe32   :  { %2167 = vmatprep.subr.bf16.mxu1 %v2490_v1 }
 0xe35   :  { %2168 = vmatpush3.bf16.msra.mxu1 %v2678_v37  ;;  %v1086_v5 = vpop.permute.xlu1 %1085 }
 0xe36   :  { %2181 = vmatprep.subr.bf16.mxu1 %v2490_v1 }
 0xe38   :  { %2170 = vmatmul.mubr.msk.bf16.vlgmr.msra.gmra.mrb[28].mxu1 %vm190_vm4, %v1086_v5 }
 0xe39   :  { %2182 = vmatpush3.bf16.msra.mxu1 %v2624_v8  ;;  %2185 = vmatprep.mubr.msk.bf16.mxu1 %vm2491_vm1, %v2490_v1 }
 0xe3a   :  { %2183 = vmatprep.subr.bf16.mxu1 %v2490_v1 }
 0xe3d   :  { %2184 = vmatpush3.bf16.msra.mxu1 %v2630_v9 }
 0xe3e   :  { %2197 = vmatprep.subr.bf16.mxu1 %v2490_v1 }
 0xe40   :  { %2186 = vmatmul.mubr.msk.bf16.vlgmr.msra.gmra.mrb[32].mxu1 %vm190_vm4, %v1086_v5 }
 0xe41   :  { %2198 = vmatpush3.bf16.msra.mxu1 %v2653_v33  ;;  %2201 = vmatprep.mubr.msk.bf16.mxu1 %vm2491_vm1, %v2490_v1 }
 0xe42   :  { %2199 = vmatprep.subr.bf16.mxu1 %v2490_v1 }
 0xe45   :  { %2200 = vmatpush3.bf16.msra.mxu1 %v2659_v34 }
 0xe46   :  { %2213 = vmatprep.subr.bf16.mxu1 %v2490_v1 }
 0xf03   :  { %v1009_v6 = vpop.f32.mrb[24].mxu1 }
 0xf04   :  { %v2155_v7 = vpop.f32.mrb[25].mxu1 }
 0xf05   :  { %v1012_v10 = vpop.f32.mrb[26].mxu1 }
 0xf06   :  { %v2156_v11 = vpop.f32.mrb[27].mxu1 }
 0xf0b   :  { %v1124_v13 = vpop.f32.mrb[28].mxu1 }
 0xf0c   :  { %v1125_v12 = vadd.f32 %v1124_v13, %v1009_v6  ;;  %v2171_v16 = vpop.f32.mrb[29].mxu1 }
 0xf0d   :  { %v1127_v14 = vpop.f32.mrb[30].mxu1 }
 0xf0e   :  { %v1130_v18 = vadd.f32 %v2703_v46, %v1125_v12  ;;  %v2172_v19 = vpop.f32.mrb[31].mxu1 }
 0xf10   :  { %2352 = vtanh.f32 %v1130_v18  ;;  %v1943_v28 = vmul.f32 -1.442695, %v1130_v18 }
 0xf13   :  { %v1236_v21 = vpop.f32.mrb[32].mxu1 }
 0xf14   :  { %v1243_v22 = vrot.slane %v1236_v21, 6  ;;  %v2187_v20 = vpop.f32.mrb[33].mxu1 }
 0xf15   :  { %v1239_v23 = vpop.f32.mrb[34].mxu1 }
 0xf16   :  { %v1245_v24 = vadd.f32 %v1243_v22, %v2640_v15  ;;  %v2188_v25 = vpop.f32.mrb[35].mxu1 }
 0xf18   :  { %2354 = vtanh.f32 %v1245_v24  ;;  %v1946_v29 = vmul.f32 -1.442695, %v1245_v24 }
 0xf19   :  { %2356 = vpow2.f32 %v1943_v28 }
 0xf1a   :  { %v2353_v26 = vpop.eup %2352  ;;  %2358 = vpow2.f32 %v1946_v29 }
 0xf1b   :  { %1140 = vrot.lane.b32.xlu0 %v2353_v26, %s2494_s17 }
 0xf22   :  { %v2355_v27 = vpop.eup %2354 }
 0xf23   :  { %1258 = vrot.lane.b32.xlu1 %v2355_v27, %s2494_s17  ;;  %v2357_v30 = vpop.eup %2356 }
 0xf24   :  { %v1134_v31 = vadd.f32 1.0, %v2357_v30  ;;  %v2359_v32 = vpop.eup %2358 }
 0xf25   :  { %v1249_v36 = vadd.f32 1.0, %v2359_v32 }
 0xf26   :  { %2360 = vrcp.f32 %v1134_v31 }
 0xf27   :  { %2362 = vrcp.f32 %v1249_v36 }
 0xf30   :  { %v2361_v38 = vpop.eup %2360 }
 0xf31   :  { %v2363_v41 = vpop.eup %2362  ;;  %v1138_v44 = vmul.f32 %v2361_v38, %v2828_v55 }
 0xf32   :  { %v1256_v49 = vmul.f32 %v2363_v41, %v1254_v48 }
 0xf8d   :  { %v1141_v39 = vpop.permute.xlu0 %1140 }
 0xf8e   :  { %v1143_v40 = vmul.f32 %v2361_v38, %v1141_v39 }
 0xf90   :  { %1145 = vrot.lane.b32.xlu0 %v1143_v40, %s2494_s17 }
 0xf95   :  { %v1259_v42 = vpop.permute.xlu1 %1258 }
 0xf96   :  { %v1261_v43 = vmul.f32 %v2363_v41, %v1259_v42 }
 0xf98   :  { %1263 = vrot.lane.b32.xlu1 %v1261_v43, %s2494_s17 }
0x1002   :  { %v1146_v45 = vpop.permute.xlu0 %1145 }
0x1003   :  { %v2867_v47 = vadd.f32 %v1146_v45, %v1138_v44 }
0x1005   :  { %2364 = vtanh.f32 %v2867_v47 }
0x100a   :  { %v1264_v50 = vpop.permute.xlu1 %1263 }
0x100b   :  { %v2871_v51 = vadd.f32 %v1264_v50, %v1256_v49 }
0x100d   :  { %2366 = vtanh.f32 %v2871_v51  ;;  %v1445_v32 = vrot.slane %v2871_v51, 6 }
0x100f   :  { %v2365_v52 = vpop.eup %2364 }
0x1010   :  { %1151 = vrot.lane.b32.xlu0 %v2365_v52, %s2494_s17  ;;  %v2410_v52 = vld [vmem:[%s3001_s3] sm:$0xff]  }
0x1017   :  { %v2367_v53 = vpop.eup %2366 }
0x1018   :  { %1269 = vrot.lane.b32.xlu1 %v2367_v53, %s2494_s17 }
0x1082   :  { %v1152_v54 = vpop.permute.xlu0 %1151 }
0x1083   :  { %v1154_v55 = vmul.f32 %v2361_v38, %v1152_v54 }
0x1085   :  { %v1155_v17 = vpack.c.bf16 %v1154_v55, %v1154_v55 }
0x1087   :  { %1157 = vrot.lane.b32.xlu0 %v1155_v17, %s2487_s21 }
0x108a   :  { %v1270_v56 = vpop.permute.xlu1 %1269 }
0x108b   :  { %v1272_v57 = vmul.f32 %v2363_v41, %v1270_v56 }
0x108d   :  { %v1273_v58 = vpack.c.bf16 %v1272_v57, %v1272_v57 }
0x108f   :  { %v1275_v59 = vrot.slane %v1273_v58, 1 }
0x1091   :  { %1276 = vrot.lane.b32.xlu1 %v1275_v59, %s2487_s21 }
0x10f9   :  { %v1158_v60 = vpop.permute.xlu0 %1157 }
0x10fa   :  { %2178 = vmatmul.mubr.msk.bf16.vlgmr.msra.gmra.mrb[32].mxu0 %vm190_vm4, %v1158_v60 }
0x10fb   :  { %2190 = vmatpush3.bf16.msra.mxu0 %v2668_v35  ;;  %2193 = vmatprep.mubr.msk.bf16.mxu0 %vm2491_vm1, %v2490_v1 }
0x10fc   :  { %2191 = vmatprep.subr.bf16.mxu0 %v2490_v1 }
0x10ff   :  { %2192 = vmatpush3.bf16.msra.mxu0 %v2678_v37 }
0x1100   :  { %2205 = vmatprep.subr.bf16.mxu0 %v2490_v1 }
0x1103   :  { %v1277_v61 = vpop.permute.xlu1 %1276 }
0x1104   :  { %2194 = vmatmul.mubr.msk.bf16.vlgmr.msra.gmra.mrb[36].mxu0 %vm190_vm4, %v1277_v61 }
0x1105   :  { %2206 = vmatpush3.bf16.msra.mxu0 %v2624_v8  ;;  %2209 = vmatprep.mubr.msk.bf16.mxu0 %vm2491_vm1, %v2490_v1 }
0x1106   :  { %2207 = vmatprep.subr.bf16.mxu0 %v2490_v1 }
0x1109   :  { %2208 = vmatpush3.bf16.msra.mxu0 %v2630_v9 }
0x110a   :  { %2221 = vmatprep.subr.bf16.mxu0 %v2490_v1 }
0x110c   :  { %2210 = vmatmul.mubr.msk.bf16.vlgmr.msra.gmra.mrb[40].mxu0 %vm190_vm4, %v1277_v61 }
0x110d   :  { %2222 = vmatpush3.bf16.msra.mxu0 %v2653_v33  ;;  %2225 = vmatprep.mubr.msk.bf16.mxu0 %vm2491_vm1, %v2490_v1 }
0x110e   :  { %2223 = vmatprep.subr.bf16.mxu0 %v2490_v1 }
0x1111   :  { %2224 = vmatpush3.bf16.msra.mxu0 %v2659_v34 }
0x1112   :  { %2237 = vmatprep.subr.bf16.mxu0 %v2490_v1 }
0x11cd   :  { %v1196_v8 = vpop.f32.mrb[32].mxu0 }
0x11ce   :  { %v2179_v62 = vpop.f32.mrb[33].mxu0 }
0x11cf   :  { %v1199_v63 = vpop.f32.mrb[34].mxu0 }
0x11d0   :  { %v2180_v0 = vpop.f32.mrb[35].mxu0 }
0x11d7   :  { %v1315_v9 = vpop.f32.mrb[36].mxu0 }
0x11d8   :  { %v1316_v2 = vadd.f32 %v1315_v9, %v1196_v8  ;;  %v2195_v3 = vpop.f32.mrb[37].mxu0 }
0x11d9   :  { %v1318_v4 = vpop.f32.mrb[38].mxu0 }
0x11da   :  { %v1321_v5 = vadd.f32 %v2703_v46, %v1316_v2  ;;  %v2196_v33 = vpop.f32.mrb[39].mxu0 }
0x11dc   :  { %2368 = vtanh.f32 %v1321_v5  ;;  %v1948_v14 = vmul.f32 -1.442695, %v1321_v5 }
0x11df   :  { %v1427_v6 = vpop.f32.mrb[40].mxu0 }
0x11e0   :  { %v1434_v7 = vrot.slane %v1427_v6, 4  ;;  %v2211_v10 = vpop.f32.mrb[41].mxu0 }
0x11e1   :  { %v1430_v11 = vpop.f32.mrb[42].mxu0 }
0x11e2   :  { %v1436_v34 = vadd.f32 %v1434_v7, %v2640_v15  ;;  %v2212_v13 = vpop.f32.mrb[43].mxu0 }
0x11e4   :  { %2370 = vtanh.f32 %v1436_v34  ;;  %v1951_v18 = vmul.f32 -1.442695, %v1436_v34 }
0x11e5   :  { %2372 = vpow2.f32 %v1948_v14 }
0x11e6   :  { %v2369_v12 = vpop.eup %2368  ;;  %2374 = vpow2.f32 %v1951_v18 }
0x11e7   :  { %1331 = vrot.lane.b32.xlu0 %v2369_v12, %s2494_s17 }
0x11ee   :  { %v2371_v16 = vpop.eup %2370 }
0x11ef   :  { %1449 = vrot.lane.b32.xlu1 %v2371_v16, %s2494_s17  ;;  %v2373_v19 = vpop.eup %2372 }
0x11f0   :  { %v1325_v21 = vadd.f32 1.0, %v2373_v19  ;;  %v2375_v22 = vpop.eup %2374 }
0x11f1   :  { %v1440_v20 = vadd.f32 1.0, %v2375_v22 }
0x11f2   :  { %2376 = vrcp.f32 %v1325_v21 }
0x11f3   :  { %2378 = vrcp.f32 %v1440_v20 }
0x11fc   :  { %v2377_v23 = vpop.eup %2376 }
0x11fd   :  { %v2379_v26 = vpop.eup %2378  ;;  %v1329_v29 = vmul.f32 %v2377_v23, %v2867_v47 }
0x11fe   :  { %v1447_v36 = vmul.f32 %v2379_v26, %v1445_v32 }
0x1259   :  { %v1332_v24 = vpop.permute.xlu0 %1331 }
0x125a   :  { %v1334_v25 = vmul.f32 %v2377_v23, %v1332_v24 }
0x125c   :  { %1336 = vrot.lane.b32.xlu0 %v1334_v25, %s2494_s17 }
0x1261   :  { %v1450_v27 = vpop.permute.xlu1 %1449 }
0x1262   :  { %v1452_v28 = vmul.f32 %v2379_v26, %v1450_v27 }
0x1264   :  { %1454 = vrot.lane.b32.xlu1 %v1452_v28, %s2494_s17 }
0x12ce   :  { %v1337_v30 = vpop.permute.xlu0 %1336 }
0x12cf   :  { %v2906_v31 = vadd.f32 %v1337_v30, %v1329_v29 }
0x12d1   :  { %2380 = vtanh.f32 %v2906_v31 }
0x12d6   :  { %v1455_v38 = vpop.permute.xlu1 %1454 }
0x12d7   :  { %v2910_v39 = vadd.f32 %v1455_v38, %v1447_v36  ;;  %v2412_v36 = vld [vmem:[%s3002_s4] sm:$0xff]   ;;  %v2413_v38 = vld [vmem:[%s3002_s4 + $0x8] sm:$0xff]  }
0x12d9   :  { %2382 = vtanh.f32 %v2910_v39  ;;  %v1636_v19 = vrot.slane %v2910_v39, 6 }
0x12db   :  { %v2381_v40 = vpop.eup %2380 }
0x12dc   :  { %1342 = vrot.lane.b32.xlu0 %v2381_v40, %s2494_s17 }
0x12e3   :  { %v2383_v41 = vpop.eup %2382 }
0x12e4   :  { %1460 = vrot.lane.b32.xlu1 %v2383_v41, %s2494_s17 }
0x134e   :  { %v1343_v42 = vpop.permute.xlu0 %1342 }
0x134f   :  { %v1345_v43 = vmul.f32 %v2377_v23, %v1343_v42 }
0x1351   :  { %v1346_v44 = vpack.c.bf16 %v1345_v43, %v1345_v43 }
0x1353   :  { %1348 = vrot.lane.b32.xlu0 %v1346_v44, %s2487_s21 }
0x1356   :  { %v1461_v45 = vpop.permute.xlu1 %1460 }
0x1357   :  { %v1463_v47 = vmul.f32 %v2379_v26, %v1461_v45 }
0x1359   :  { %v1464_v48 = vpack.c.bf16 %v1463_v47, %v1463_v47 }
0x135b   :  { %v1466_v49 = vrot.slane %v1464_v48, 2 }
0x135d   :  { %1467 = vrot.lane.b32.xlu1 %v1466_v49, %s2487_s21  ;;  %v2414_v49 = vld [vmem:[%s3004_s6] ss:$0 sm:$0xff] }
0x13c5   :  { %v1349_v50 = vpop.permute.xlu0 %1348 }
0x13c6   :  { %2202 = vmatmul.mubr.msk.bf16.vlgmr.msra.gmra.mrb[36].mxu1 %vm190_vm4, %v1349_v50 }
0x13c7   :  { %2214 = vmatpush3.bf16.msra.mxu1 %v2668_v35  ;;  %2217 = vmatprep.mubr.msk.bf16.mxu1 %vm2491_vm1, %v2490_v1  ;;  %v2411_v35 = vld [vmem:[%s3001_s3 + $0x8] sm:$0xff]  }
0x13c8   :  { %2215 = vmatprep.subr.bf16.mxu1 %v2490_v1 }
0x13cb   :  { %2216 = vmatpush3.bf16.msra.mxu1 %v2678_v37 }
0x13cc   :  { %2229 = vmatprep.subr.bf16.mxu1 %v2490_v1 }
0x13cf   :  { %v1468_v51 = vpop.permute.xlu1 %1467 }
0x13d0   :  { %2218 = vmatmul.mubr.msk.bf16.vlgmr.msra.gmra.mrb[40].mxu1 %vm190_vm4, %v1468_v51 }
0x13d1   :  { %2230 = vmatpush3.bf16.msra.mxu1 %v2410_v52  ;;  %2233 = vmatprep.mubr.msk.bf16.mxu1 %vm2491_vm1, %v2490_v1 }
0x13d2   :  { %2231 = vmatprep.subr.bf16.mxu1 %v2490_v1 }
0x13d5   :  { %2232 = vmatpush3.bf16.msra.mxu1 %v2411_v35 }
0x13d6   :  { %2245 = vmatprep.subr.bf16.mxu1 %v2490_v1 }
0x13d8   :  { %2234 = vmatmul.mubr.msk.bf16.vlgmr.msra.gmra.mrb[44].mxu1 %vm190_vm4, %v1468_v51 }
0x13d9   :  { %2249 = vmatprep.mubr.msk.bf16.mxu1 %vm2491_vm1, %v2490_v1 }
0x1499   :  { %v1387_v37 = vpop.f32.mrb[36].mxu1 }
0x149a   :  { %v2203_v53 = vpop.f32.mrb[37].mxu1 }
0x149b   :  { %v1390_v54 = vpop.f32.mrb[38].mxu1 }
0x149c   :  { %v2204_v55 = vpop.f32.mrb[39].mxu1 }
0x14a3   :  { %v1506_v17 = vpop.f32.mrb[40].mxu1 }
0x14a4   :  { %v1507_v56 = vadd.f32 %v1506_v17, %v1387_v37  ;;  %v2219_v57 = vpop.f32.mrb[41].mxu1 }
0x14a5   :  { %v1509_v58 = vpop.f32.mrb[42].mxu1 }
0x14a6   :  { %v1512_v59 = vadd.f32 %v2703_v46, %v1507_v56  ;;  %v2220_v60 = vpop.f32.mrb[43].mxu1 }
0x14a8   :  { %2384 = vtanh.f32 %v1512_v59  ;;  %v1953_v4 = vmul.f32 -1.442695, %v1512_v59 }
0x14ab   :  { %v1618_v61 = vpop.f32.mrb[44].mxu1 }
0x14ac   :  { %v1625_v8 = vrot.slane %v1618_v61, 2  ;;  %v2235_v62 = vpop.f32.mrb[45].mxu1 }
0x14ad   :  { %v1621_v63 = vpop.f32.mrb[46].mxu1 }
0x14ae   :  { %v1627_v0 = vadd.f32 %v1625_v8, %v2640_v15  ;;  %v2236_v9 = vpop.f32.mrb[47].mxu1  ;;  %v1959_v63 = vld [vmem:[%s3005_s7] ss:$0 sm:$0xff] }
0x14b0   :  { %2386 = vtanh.f32 %v1627_v0  ;;  %v1956_v5 = vmul.f32 -1.442695, %v1627_v0 }
0x14b1   :  { %2388 = vpow2.f32 %v1953_v4 }
0x14b2   :  { %v2385_v2 = vpop.eup %2384  ;;  %2390 = vpow2.f32 %v1956_v5 }
0x14b3   :  { %1522 = vrot.lane.b32.xlu0 %v2385_v2, %s2494_s17 }
0x14ba   :  { %v2387_v3 = vpop.eup %2386 }
0x14bb   :  { %1640 = vrot.lane.b32.xlu1 %v2387_v3, %s2494_s17  ;;  %v2389_v46 = vpop.eup %2388 }
0x14bc   :  { %v1516_v33 = vadd.f32 1.0, %v2389_v46  ;;  %v2391_v6 = vpop.eup %2390  ;;  %v1960_v46 = vld [vmem:[%s3006_s8] ss:$0 sm:$0xff] }
0x14bd   :  { %v1631_v7 = vadd.f32 1.0, %v2391_v6  ;;  %v2278_v6 = vld [vmem:[%s3007_s9 + $0x8] sm:$0xff]  }
0x14be   :  { %2392 = vrcp.f32 %v1516_v33  ;;  %v2277_v33 = vld [vmem:[%s3007_s9] sm:$0xff]  }
0x14bf   :  { %2394 = vrcp.f32 %v1631_v7  ;;  %2246 = vmatpush3.bf16.msra.mxu1 %v2277_v33 }
0x14c0   :  { %2247 = vmatprep.subr.bf16.mxu1 %v2490_v1 }
0x14c3   :  { %2248 = vmatpush3.bf16.msra.mxu1 %v2278_v6 }
0x14c8   :  { %v2393_v10 = vpop.eup %2392 }
0x14c9   :  { %v2395_v34 = vpop.eup %2394  ;;  %v1520_v16 = vmul.f32 %v2393_v10, %v2906_v31 }
0x14ca   :  { %v1638_v21 = vmul.f32 %v2395_v34, %v1636_v19 }
0x1525   :  { %v1523_v15 = vpop.permute.xlu0 %1522 }
0x1526   :  { %v1525_v11 = vmul.f32 %v2393_v10, %v1523_v15 }
0x1528   :  { %1527 = vrot.lane.b32.xlu0 %v1525_v11, %s2494_s17 }
0x152d   :  { %v1641_v13 = vpop.permute.xlu1 %1640 }
0x152e   :  { %v1643_v12 = vmul.f32 %v2395_v34, %v1641_v13 }
0x1530   :  { %1645 = vrot.lane.b32.xlu1 %v1643_v12, %s2494_s17 }
0x159a   :  { %v1528_v14 = vpop.permute.xlu0 %1527 }
0x159b   :  { %v1530_v18 = vadd.f32 %v1528_v14, %v1520_v16 }
0x159d   :  { %2396 = vtanh.f32 %v1530_v18 }
0x15a2   :  { %v1646_v22 = vpop.permute.xlu1 %1645 }
0x15a3   :  { %v1648_v20 = vadd.f32 %v1646_v22, %v1638_v21  ;;  %v1961_v21 = vld [vmem:[%s3008_s10] ss:$0 sm:$0xff] }
0x15a5   :  { %2398 = vtanh.f32 %v1648_v20 }
0x15a7   :  { %v2397_v23 = vpop.eup %2396 }
0x15a8   :  { %1533 = vrot.lane.b32.xlu0 %v2397_v23, %s2494_s17 }
0x15af   :  { %v2399_v24 = vpop.eup %2398 }
0x15b0   :  { %1651 = vrot.lane.b32.xlu1 %v2399_v24, %s2494_s17 }
0x161a   :  { %v1534_v25 = vpop.permute.xlu0 %1533 }
0x161b   :  { %v1536_v26 = vmul.f32 %v2393_v10, %v1534_v25 }
0x161d   :  { %v1537_v27 = vpack.c.bf16 %v1536_v26, %v1536_v26 }
0x161f   :  { %1539 = vrot.lane.b32.xlu0 %v1537_v27, %s2487_s21 }
0x1622   :  { %v1652_v28 = vpop.permute.xlu1 %1651 }
0x1623   :  { %v1654_v29 = vmul.f32 %v2395_v34, %v1652_v28  ;;  %v1965_v28 = vld [vmem:[#allocation2] ss:$0 sm:$0xff] }
0x1625   :  { %v1655_v30 = vpack.c.bf16 %v1654_v29, %v1654_v29 }
0x1627   :  { %v1657_v31 = vrot.slane %v1655_v30, 3 }
0x1629   :  { %1658 = vrot.lane.b32.xlu1 %v1657_v31, %s2487_s21 }
0x1691   :  { %v1540_v32 = vpop.permute.xlu0 %1539 }
0x1692   :  { %2226 = vmatmul.mubr.msk.bf16.vlgmr.msra.gmra.mrb[44].mxu0 %vm190_vm4, %v1540_v32 }
0x1693   :  { %2238 = vmatpush3.bf16.msra.mxu0 %v2412_v36  ;;  %2241 = vmatprep.mubr.msk.bf16.mxu0 %vm2491_vm1, %v2490_v1 }
0x1694   :  { %2239 = vmatprep.subr.bf16.mxu0 %v2490_v1 }
0x1697   :  { %2240 = vmatpush3.bf16.msra.mxu0 %v2413_v38 }
0x1698   :  { %2253 = vmatprep.subr.bf16.mxu0 %v2490_v1 }
0x169b   :  { %v1659_v39 = vpop.permute.xlu1 %1658 }
0x169c   :  { %2242 = vmatmul.mubr.msk.bf16.vlgmr.msra.gmra.mrb[48].mxu0 %vm190_vm4, %v1659_v39 }
0x169d   :  { %2255 = vmatprep.mubr.msk.bf16.mxu0 %vm2491_vm1, %v2490_v1  ;;  %v2279_v1 = vld [vmem:[%s3009_s11] sm:$0xff]  }
0x169e   :  { %2254 = vmatpush3.bf16.msra.mxu0 %v2279_v1 }
0x1765   :  { %v1578_v40 = vpop.f32.mrb[44].mxu0 }
0x1766   :  { %v2227_v41 = vpop.f32.mrb[45].mxu0 }
0x1767   :  { %v1581_v42 = vpop.f32.mrb[46].mxu0 }
0x1768   :  { %v2228_v43 = vpop.f32.mrb[47].mxu0 }
0x176f   :  { %v1697_v44 = vpop.f32.mrb[48].mxu0 }
0x1770   :  { %v1698_v45 = vadd.f32 %v1697_v44, %v1578_v40  ;;  %v2243_v47 = vpop.f32.mrb[49].mxu0 }
0x1771   :  { %v1700_v48 = vpop.f32.mrb[50].mxu0 }
0x1772   :  { %v1703_v50 = vadd.f32 %v2414_v49, %v1698_v45  ;;  %v2244_v51 = vpop.f32.mrb[51].mxu0 }
0x1774   :  { %2400 = vtanh.f32 %v1703_v50  ;;  %v1958_v35 = vmul.f32 -1.442695, %v1703_v50 }
0x1776   :  { %2402 = vpow2.f32 %v1958_v35 }
0x177e   :  { %v2401_v52 = vpop.eup %2400 }
0x177f   :  { %1713 = vrot.lane.b32.xlu0 %v2401_v52, %s2494_s17 }
0x1780   :  { %v2403_v37 = vpop.eup %2402 }
0x1781   :  { %v1707_v53 = vadd.f32 1.0, %v2403_v37 }
0x1783   :  { %2404 = vrcp.f32 %v1707_v53 }
0x178d   :  { %v2405_v54 = vpop.eup %2404 }
0x178e   :  { %v1711_v56 = vmul.f32 %v2405_v54, %v1530_v18 }
0x17f1   :  { %v1714_v55 = vpop.permute.xlu0 %1713 }
0x17f2   :  { %v1716_v17 = vmul.f32 %v2405_v54, %v1714_v55 }
0x17f4   :  { %1718 = vrot.lane.b32.xlu1 %v1716_v17, %s2494_s17 }
0x1866   :  { %v1719_v57 = vpop.permute.xlu1 %1718 }
0x1867   :  { %v1721_v58 = vadd.f32 %v1719_v57, %v1711_v56 }
0x1869   :  { %2406 = vtanh.f32 %v1721_v58 }
0x1873   :  { %v2407_v59 = vpop.eup %2406 }
0x1874   :  { %1724 = vrot.lane.b32.xlu0 %v2407_v59, %s2494_s17 }
0x18e6   :  { %v1725_v60 = vpop.permute.xlu0 %1724 }
0x18e7   :  { %v1727_v61 = vmul.f32 %v2405_v54, %v1725_v60 }
0x18e9   :  { %1729 = vrot.lane.b32.xlu1 %v1727_v61, %s2487_s21 }
0x195b   :  { %v1730_v8 = vpop.permute.xlu1 %1729 }
0x195c   :  { %v1733_v62 = vsel %vm1732_vm5, %v1730_v8, 0.0 }
0x195d   :  { %1734 = vadd.xlane.f32.xlu0 %v1733_v62 }
0x1973   :  { %1757 = vrot.lane.b32.xlu0 %v1959_v63, %s2487_s21 }
0x19ea   :  { %v1735_v0 = vpop.xlane.xlu0 %1734 }
0x19eb   :  { %v1737_v9 = vmul.f32 0.03125, %v1735_v0 }
0x19ed   :  { %v1738_v2 = vsub.f32 %v1727_v61, %v1737_v9 }
0x19ee   :  { %v1758_v34 = vpop.permute.xlu0 %1757 }
0x19ef   :  { %v1739_v3 = vmul.f32 %v1738_v2, %v1738_v2 }
0x19f1   :  { %1741 = vrot.lane.b32.xlu1 %v1739_v3, %s2487_s21 }
0x1a63   :  { %v1742_v4 = vpop.permute.xlu1 %1741 }
0x1a64   :  { %v1744_v5 = vsel %vm1732_vm5, %v1742_v4, 0.0 }
0x1a65   :  { %1745 = vadd.xlane.f32.xlu1 %v1744_v5 }
0x1a76   :  { %1767 = vrot.lane.b32.xlu1 %v1960_v46, %s2487_s21 }
0x1af2   :  { %v1746_v7 = vpop.xlane.xlu1 %1745 }
0x1af3   :  { %v1747_v10 = vmul.f32 0.03125, %v1746_v7 }
0x1af5   :  { %v1748_v15 = vadd.f32 1e-05, %v1747_v10 }
0x1af6   :  { %v1768_v12 = vpop.permute.xlu1 %1767 }
0x1af7   :  { %2408 = vrsqrt.f32 %v1748_v15 }
0x1b01   :  { %v2409_v11 = vpop.eup %2408 }
0x1b02   :  { %v1750_v13 = vmul.f32 %v2409_v11, %v1738_v2 }
0x1b04   :  { %v1760_v16 = vmul.f32 %v1758_v34, %v1750_v13 }
0x1b06   :  { %v1770_v14 = vadd.f32 %v1768_v12, %v1760_v16 }
0x1b08   :  { %v1771_v18 = vpack.c.bf16 %v1770_v14, %v1770_v14 }
0x1b0a   :  { %1784 = vrot.lane.b32.xlu0 %v1771_v18, %s2487_s21 }
0x1b7c   :  { %v1785_v19 = vpop.permute.xlu0 %1784 }
0x1b7d   :  { %2250 = vmatmul.mubr.msk.bf16.vlgmr.msra.gmra.mrb[48].mxu1 %vm190_vm4, %v1785_v19 }
0x1c50   :  { %v1835_v22 = vpop.f32.mrb[48].mxu1 }
0x1c51   :  { %v1836_v20 = vadd.f32 %v1961_v21, %v1835_v22  ;;  %v2251_v23 = vpop.f32.mrb[49].mxu1 }
0x1c52   :  { %v1838_v24 = vpop.f32.mrb[50].mxu1 }
0x1c53   :  { %v1841_v25 = vmax.f32 %v1836_v20, 0.0  ;;  %v2252_v26 = vpop.f32.mrb[51].mxu1 }
0x1c55   :  { %v1842_v27 = vpack.c.bf16 %v1841_v25, %v1841_v25 }
0x1c57   :  { %2256 = vmatmul.mubr.msk.bf16.vlgmr.msra.gmra.mrb[52].mxu0 %vm1858_vm6, %v1842_v27 }
0x1d2a   :  { %v1896_v29 = vpop.f32.mrb[52].mxu0 }
0x1d2b   :  { %v1897_v30 = vadd.f32 %v1965_v28, %v1896_v29  ;;  %v2257_v31 = vpop.f32.mrb[53].mxu0 }
0x1d2c   :  { %v1899_v32 = vpop.f32.mrb[54].mxu0 }
0x1d2d   :  { %1903 = vst.msk [vmem:[%s3011_s13] sm:$0x3] %vm1902_vm7, %v1897_v30  ;;  %v2258_v36 = vpop.f32.mrb[55].mxu0 }
0x1d2e   :  { %1908 = vsyncpa [#allocation4], 1 }
0x1d2f   :  { %1909 = vsyncpa [#allocation6], 1 }

</bundles_post_ra>
